<compile_context>
chip_gen: v7x
topology: tpu7x:2x2x1
jax: 0.10.0
libtpu: 0.0.40
codegen_flags: <defaults>
</compile_context>

<pallas_src>
import functools

import jax
import jax.numpy as jnp
from jax import lax
from jax.experimental import pallas as pl
from jax.experimental.pallas import tpu as pltpu

BN_EPS = 1e-5
RES_SCALE = 1.0 / 1.414          # ResidualConvBlock divides by the literal 1.414
_GELU_C = 0.7978845608028654     # sqrt(2/pi)

_VMEM_LIMIT_CACHE = None


def _vmem_limit_bytes():
    """Per-generation scoped-VMEM budget (~75% of physical, conservative fallback)."""
    global _VMEM_LIMIT_CACHE
    if _VMEM_LIMIT_CACHE is None:
        cap = 64 * 1024 * 1024                      # safe fallback (v7x physical VMEM)
        try:
            cap = int(pltpu.get_tpu_info().vmem_capacity_bytes)
        except Exception:                           # older jax / query unavailable
            pass
        _VMEM_LIMIT_CACHE = int(min(cap * 3 // 4, 100 * 1024 * 1024))
    return _VMEM_LIMIT_CACHE


def _cparams(semantics):
    return pltpu.CompilerParams(dimension_semantics=semantics,
                                vmem_limit_bytes=_vmem_limit_bytes())


def _gelu_tanh(x):
    # tanh-approx GELU -> EUP slot (exact erf would be a VALU-bound polynomial).
    return 0.5 * x * (1.0 + jnp.tanh(_GELU_C * (x + 0.044715 * x * x * x)))


def _choose_block(total, mult, target):
    """Largest multiple of `mult` dividing `total` that is <= max(target, mult)."""
    assert total % mult == 0, (total, mult)
    target = max(target, mult)
    best = mult
    b = mult
    while b <= total:
        if total % b == 0 and b <= target:
            best = b
        b += mult
    return best


# ---------------- kernels ----------------

def _conv_transpose_kernel(x_ref, w0_ref, w1_ref, b_ref, o_ref):
    # ConvTranspose2d(k=2, s=2): two dots against the a=0 / a=1 block-diagonal weights,
    # rows interleaved (output row 2i <- a=0, 2i+1 <- a=1) into a dense 2-D store.
    bhi = x_ref.shape[0]
    lanes_out = o_ref.shape[1]
    xb = x_ref[...].astype(jnp.bfloat16)
    top = jnp.dot(xb, w0_ref[...], preferred_element_type=jnp.float32) + b_ref[...]
    bot = jnp.dot(xb, w1_ref[...], preferred_element_type=jnp.float32) + b_ref[...]
    y = jnp.concatenate([top[:, None, :], bot[:, None, :]], axis=1)   # (bhi, 2, L)
    o_ref[...] = y.reshape(2 * bhi, lanes_out)


def _banded_conv_and_stats(x, wb_ref, b_ref, z_ref, ps_ref, *, H2):
    # 3x3 SAME conv on rows=(n,h), lanes=(w,c): three per-dy matmuls against banded
    # (W*C, W*Cout) weights.  dx zero-padding is encoded in the band; dy zero-padding at
    # (in-block) image boundaries is handled by the row masks below.
    bh, lanes_in = x.shape
    zrow = jnp.zeros((1, lanes_in), x.dtype)
    ctx = jnp.concatenate([zrow, x, zrow], axis=0)               # (bh + 2, W*C)
    row = lax.broadcasted_iota(jnp.int32, (bh, 1), 0) % H2       # row index within image
    acc = None
    for dy in range(3):
        tap = ctx[dy:dy + bh, :]
        if dy == 0:
            tap = tap * (row != 0).astype(x.dtype)               # no row above first row
        elif dy == 2:
            tap = tap * (row != H2 - 1).astype(x.dtype)          # no row below last row
        d = jnp.dot(tap.astype(jnp.bfloat16), wb_ref[dy],
                    preferred_element_type=jnp.float32)
        acc = d if acc is None else acc + d
    acc = acc + b_ref[...]
    z_ref[...] = acc
    # Per-block partial BN statistics (sum, sumsq); reduced + rsqrt'ed later in XLA.
    # TODO(synk): single-sweep E[x^2]-mean^2 can cancel badly if mean^2 >> var.
    ps = jnp.concatenate([jnp.sum(acc, axis=0, keepdims=True),
                          jnp.sum(acc * acc, axis=0, keepdims=True)], axis=0)
    ps_ref[...] = ps[None, :, :]


def _conv3x3_kernel(x_ref, wb_ref, b_ref, z_ref, ps_ref, *, H2):
    _banded_conv_and_stats(x_ref[...], wb_ref, b_ref, z_ref, ps_ref, H2=H2)


def _bn_gelu_conv3x3_kernel(x_ref, s_ref, t_ref, wb_ref, b_ref, z_ref, ps_ref, *, H2):
    # Normalize+GELU the previous conv's pre-activation on the fly, then conv.
    xn = _gelu_tanh(x_ref[...] * s_ref[...] + t_ref[...])
    _banded_conv_and_stats(xn, wb_ref, b_ref, z_ref, ps_ref, H2=H2)


def _bn_gelu_residual_kernel(z_ref, s_ref, t_ref, res_ref, o_ref):
    xn = _gelu_tanh(z_ref[...] * s_ref[...] + t_ref[...])
    o_ref[...] = (res_ref[...] + xn) * RES_SCALE     # same_channels residual, /1.414


# ---------------- pallas_call wrappers ----------------

def conv_transpose_2x2(x2d, w0, w1, b_t, *, bhi):
    rows, lanes_in = x2d.shape
    lanes_out = w0.shape[1]
    return pl.pallas_call(
        _conv_transpose_kernel,
        out_shape=jax.ShapeDtypeStruct((2 * rows, lanes_out), jnp.float32),
        grid=(rows // bhi,),
        in_specs=[pl.BlockSpec((bhi, lanes_in), lambda i: (i, 0)),
                  pl.BlockSpec(w0.shape, lambda i: (0, 0)),
                  pl.BlockSpec(w1.shape, lambda i: (0, 0)),
                  pl.BlockSpec(b_t.shape, lambda i: (0, 0))],
        out_specs=pl.BlockSpec((2 * bhi, lanes_out), lambda i: (i, 0)),
        compiler_params=_cparams(("parallel",)),
        cost_estimate=pl.CostEstimate(
            flops=int(4 * rows * lanes_in * lanes_out), transcendentals=0,
            bytes_accessed=int(4 * x2d.size + 2 * (w0.size + w1.size)
                               + 4 * (b_t.size + 2 * rows * lanes_out))),
    )(x2d, w0, w1, b_t)


def conv3x3_stats(x2d, wb, b_t, *, H2, bh):
    rows, lanes_in = x2d.shape
    lanes_out = wb.shape[2]
    nblk = rows // bh
    return pl.pallas_call(
        functools.partial(_conv3x3_kernel, H2=H2),
        out_shape=(jax.ShapeDtypeStruct((rows, lanes_out), jnp.float32),
                   jax.ShapeDtypeStruct((nblk, 2, lanes_out), jnp.float32)),
        grid=(nblk,),
        in_specs=[pl.BlockSpec((bh, lanes_in), lambda i: (i, 0)),
                  pl.BlockSpec(wb.shape, lambda i: (0, 0, 0)),
                  pl.BlockSpec(b_t.shape, lambda i: (0, 0))],
        out_specs=(pl.BlockSpec((bh, lanes_out), lambda i: (i, 0)),
                   pl.BlockSpec((1, 2, lanes_out), lambda i: (i, 0, 0))),
        compiler_params=_cparams(("parallel",)),
        cost_estimate=pl.CostEstimate(
            flops=int(6 * rows * lanes_in * lanes_out), transcendentals=0,
            bytes_accessed=int(4 * (x2d.size + rows * lanes_out) + 2 * wb.size)),
    )(x2d, wb, b_t)


def bn_gelu_conv3x3_stats(x2d, scale_t, shift_t, wb, b_t, *, H2, bh):
    rows, lanes_in = x2d.shape
    lanes_out = wb.shape[2]
    nblk = rows // bh
    return pl.pallas_call(
        functools.partial(_bn_gelu_conv3x3_kernel, H2=H2),
        out_shape=(jax.ShapeDtypeStruct((rows, lanes_out), jnp.float32),
                   jax.ShapeDtypeStruct((nblk, 2, lanes_out), jnp.float32)),
        grid=(nblk,),
        in_specs=[pl.BlockSpec((bh, lanes_in), lambda i: (i, 0)),
                  pl.BlockSpec(scale_t.shape, lambda i: (0, 0)),
                  pl.BlockSpec(shift_t.shape, lambda i: (0, 0)),
                  pl.BlockSpec(wb.shape, lambda i: (0, 0, 0)),
                  pl.BlockSpec(b_t.shape, lambda i: (0, 0))],
        out_specs=(pl.BlockSpec((bh, lanes_out), lambda i: (i, 0)),
                   pl.BlockSpec((1, 2, lanes_out), lambda i: (i, 0, 0))),
        compiler_params=_cparams(("parallel",)),
        cost_estimate=pl.CostEstimate(
            flops=int(6 * rows * lanes_in * lanes_out),
            transcendentals=int(rows * lanes_in),
            bytes_accessed=int(4 * (x2d.size + rows * lanes_out) + 2 * wb.size)),
    )(x2d, scale_t, shift_t, wb, b_t)


def bn_gelu_residual(z2d, scale_t, shift_t, res2d, *, bh):
    rows, lanes = z2d.shape
    return pl.pallas_call(
        _bn_gelu_residual_kernel,
        out_shape=jax.ShapeDtypeStruct((rows, lanes), jnp.float32),
        grid=(rows // bh,),
        in_specs=[pl.BlockSpec((bh, lanes), lambda i: (i, 0)),
                  pl.BlockSpec(scale_t.shape, lambda i: (0, 0)),
                  pl.BlockSpec(shift_t.shape, lambda i: (0, 0)),
                  pl.BlockSpec((bh, lanes), lambda i: (i, 0))],
        out_specs=pl.BlockSpec((bh, lanes), lambda i: (i, 0)),
        compiler_params=_cparams(("parallel",)),
        cost_estimate=pl.CostEstimate(
            flops=int(10 * rows * lanes), transcendentals=int(rows * lanes),
            bytes_accessed=int(4 * 3 * rows * lanes)),
    )(z2d, scale_t, shift_t, res2d)


# ---------------- BN reduce + affine (tiny, plain XLA between pallas_calls) ----------------

def _bn_affine(partials, gamma, beta, count, W, Cout):
    # partials: (nblk, 2, W*Cout) per-block [sum, sumsq] -> per-channel scale/shift,
    # W-tiled so the kernels do a single fused multiply-add per element.
    s = partials.reshape(partials.shape[0], 2, W, Cout).sum(axis=(0, 2))   # (2, Cout)
    mean = s[0] / count
    var = jnp.maximum(s[1] / count - mean * mean, 0.0)                      # biased var
    scale = gamma * lax.rsqrt(var + BN_EPS)
    shift = beta - mean * scale
    return (jnp.tile(scale, W).reshape(1, W * Cout),
            jnp.tile(shift, W).reshape(1, W * Cout))


# ---------------- forward ----------------

def up_block_forward(x, kp, *, block_rows_target=256, ct_rows_target=128):
    N, H, W, Cin = x.shape
    Cout = kp["g1"].shape[0]
    H2, W2 = 2 * H, 2 * W
    rows_in, rows_out = N * H, N * H2
    assert H2 % 8 == 0, "H2 = 2*H must be a multiple of 8 (sublane alignment)"

    # Conv blocks hold a whole number of images; image-boundary padding is in-kernel.
    bh = _choose_block(rows_out, H2, block_rows_target)
    ct_mult = 8 if rows_in % 8 == 0 else rows_in
    bhi = _choose_block(rows_in, ct_mult, ct_rows_target)

    x2d = x.reshape(rows_in, W * Cin)                               # free row-major reshape
    up2d = conv_transpose_2x2(x2d, kp["ct_w0"], kp["ct_w1"], kp["ct_b"], bhi=bhi)

    count = float(N * H2 * W2)
    z1, ps1 = conv3x3_stats(up2d, kp["wb1"], kp["b1t"], H2=H2, bh=bh)
    s1, t1 = _bn_affine(ps1, kp["g1"], kp["be1"], count, W2, Cout)
    z2, ps2 = bn_gelu_conv3x3_stats(z1, s1, t1, kp["wb2"], kp["b2t"], H2=H2, bh=bh)
    s2, t2 = _bn_affine(ps2, kp["g2"], kp["be2"], count, W2, Cout)
    out2d = bn_gelu_residual(z2, s2, t2, up2d, bh=bh)
    return out2d.reshape(N, H2, W2, Cout)                           # free row-major reshape


# ---------------- parameters ----------------

def init_params(key, cin, cout):
    ks = jax.random.split(key, 6)
    return dict(
        wt=jax.random.normal(ks[0], (2, 2, cin, cout), jnp.float32) * 0.1,   # [a,b,ci,co]
        bt=jax.random.normal(ks[1], (cout,), jnp.float32) * 0.1,
        w1=jax.random.normal(ks[2], (3, 3, cout, cout), jnp.float32) * 0.1,  # [dy,dx,ci,co]
        b1=jax.random.normal(ks[3], (cout,), jnp.float32) * 0.1,
        w2=jax.random.normal(ks[4], (3, 3, cout, cout), jnp.float32) * 0.1,
        b2=jax.random.normal(ks[5], (cout,), jnp.float32) * 0.1,
        g1=jnp.ones((cout,), jnp.float32), be1=jnp.zeros((cout,), jnp.float32),
        g2=jnp.ones((cout,), jnp.float32), be2=jnp.zeros((cout,), jnp.float32),
    )


def prepare_kernel_params(p, W):
    """Precompute matmul-layout (block-diag / banded, bf16) weights once, outside jit."""
    cin, cout = p["wt"].shape[2], p["wt"].shape[3]
    W2 = 2 * W
    eye_w = jnp.eye(W, dtype=jnp.float32)

    def ct_blockdiag(a):
        # per-pixel (Cin, 2*Cout) matrix [ci, b*Cout+co] -> block-diagonal (W*Cin, 2W*Cout)
        m = p["wt"][a].transpose(1, 0, 2).reshape(cin, 2 * cout)
        return jnp.einsum("jk,cd->jckd", eye_w, m).reshape(
            W * cin, 2 * W * cout).astype(jnp.bfloat16)

    def banded(w):
        # per-dy banded weight: [w_in*C+ci, w_out*Co+co] = w[dy, w_in-w_out+1, ci, co]
        C, Co = w.shape[2], w.shape[3]
        mats = []
        for dy in range(3):
            acc = None
            for dx in range(3):
                t = jnp.einsum("io,cd->icod",
                               jnp.eye(W2, k=1 - dx, dtype=jnp.float32), w[dy, dx])
                acc = t if acc is None else acc + t
            mats.append(acc.reshape(W2 * C, W2 * Co))
        return jnp.stack(mats).astype(jnp.bfloat16)

    return dict(
        ct_w0=ct_blockdiag(0), ct_w1=ct_blockdiag(1),
        ct_b=jnp.tile(p["bt"], 2 * W).reshape(1, 2 * W * cout),
        wb1=banded(p["w1"]), b1t=jnp.tile(p["b1"], W2).reshape(1, W2 * cout),
        wb2=banded(p["w2"]), b2t=jnp.tile(p["b2"], W2).reshape(1, W2 * cout),
        g1=p["g1"], be1=p["be1"], g2=p["g2"], be2=p["be2"],
    )


# ---------------- pure-JAX reference (exact f32 / erf GELU, matches PyTorch math) ----------------

def reference_forward(x, p):
    N, H, W, _ = x.shape
    Cout = p["bt"].shape[0]
    up = jnp.einsum("nhwc,abcd->nhawbd", x, p["wt"])
    up = up.reshape(N, 2 * H, 2 * W, Cout) + p["bt"].reshape(1, 1, 1, -1)

    def conv_bn_gelu(z, w, b, g, be):
        y = lax.conv_general_dilated(z, w, (1, 1), "SAME",
                                     dimension_numbers=("NHWC", "HWIO", "NHWC"))
        y = y + b.reshape(1, 1, 1, -1)
        mean = jnp.mean(y, axis=(0, 1, 2), keepdims=True)
        var = jnp.mean((y - mean) ** 2, axis=(0, 1, 2), keepdims=True)
        y = (y - mean) * lax.rsqrt(var + BN_EPS) * g.reshape(1, 1, 1, -1) \
            + be.reshape(1, 1, 1, -1)
        return jax.nn.gelu(y, approximate=False)

    x1 = conv_bn_gelu(up, p["w1"], p["b1"], p["g1"], p["be1"])
    x2 = conv_bn_gelu(x1, p["w2"], p["b2"], p["g2"], p["be2"])
    return (up + x2) / 1.414


if __name__ == "__main__":
    key = jax.random.PRNGKey(0)
    kx, kw = jax.random.split(key)
    # UpBlock(8 -> 8): input NHWC (2, 8, 8, 8) -> output (2, 16, 16, 8)
    N, Cin, Cout, H, W = 2, 8, 8, 8, 8
    x = jax.random.normal(kx, (N, H, W, Cin), jnp.float32)
    params = init_params(kw, Cin, Cout)
    kparams = prepare_kernel_params(params, W)

    ref = jax.block_until_ready(reference_forward(x, params))

    # Default config: one large block (whole batch per grid step).
    fwd = jax.jit(up_block_forward)
    out = jax.block_until_ready(fwd(x, kparams))
    assert out.shape == (N, 2 * H, 2 * W, Cout), out.shape
    err = float(jnp.max(jnp.abs(out - ref)))
    # Tolerance covers bf16 MXU operands + tanh GELU (reference is exact f32 / erf).
    assert bool(jnp.allclose(out, ref, atol=5e-2, rtol=5e-2)), f"max abs err {err}"

    # Smaller blocks: exercises the multi-block / partial-BN-stats reduction path.
    fwd_small = jax.jit(functools.partial(up_block_forward,
                                          block_rows_target=16, ct_rows_target=8))
    out_small = jax.block_until_ready(fwd_small(x, kparams))
    err_small = float(jnp.max(jnp.abs(out_small - ref)))
    assert bool(jnp.allclose(out_small, ref, atol=5e-2, rtol=5e-2)), f"max abs err {err_small}"

    print("KERNEL_OK")
</pallas_src>

<mosaic_0001>
module attributes {stable_mosaic.version = 11 : i64} {
  func.func @_conv3x3_kernel(%arg0: i32, %arg1: memref<32x128xf32, #tpu.memory_space<vmem>>, %arg2: memref<3x128x128xbf16, #tpu.memory_space<vmem>>, %arg3: memref<1x128xf32, #tpu.memory_space<vmem>>, %arg4: memref<32x128xf32, #tpu.memory_space<vmem>>, %arg5: memref<1x2x128xf32, #tpu.memory_space<vmem>>) attributes {dimension_semantics = [#tpu.dimension_semantics<parallel>], iteration_bounds = array<i64: 1>, scalar_prefetch = 0 : i64, scratch_operands = 0 : i64, tpu.core_type = #tpu.core_type<tc>, window_params = [{transform_indices = @transform_0, window_bounds = array<i64: 32, 128>}, {pipeline_mode = #tpu.pipeline_mode<synchronous>, transform_indices = @transform_1, window_bounds = array<i64: 3, 128, 128>}, {pipeline_mode = #tpu.pipeline_mode<synchronous>, transform_indices = @transform_2, window_bounds = array<i64: 1, 128>}, {transform_indices = @transform_3, window_bounds = array<i64: 32, 128>}, {transform_indices = @transform_4, window_bounds = array<i64: 1, 2, 128>}]} {
    %c0 = arith.constant 0 : index
    %c0_0 = arith.constant 0 : index
    %0 = vector.load %arg1[%c0, %c0_0] : memref<32x128xf32, #tpu.memory_space<vmem>>, vector<32x128xf32>
    %cst = arith.constant 0.000000e+00 : f32
    %1 = vector.broadcast %cst : f32 to vector<1x128xf32>
    %2 = tpu.concatenate %1, %0, %1 in 0 : vector<1x128xf32>, vector<32x128xf32>, vector<1x128xf32> -> vector<34x128xf32>
    %3 = tpu.iota {dimensions = array<i32: 0>} : vector<32x1xi32>
    %c16_i32 = arith.constant 16 : i32
    %c0_i32 = arith.constant 0 : i32
    %4 = arith.cmpi eq, %c16_i32, %c0_i32 : i32
    %c1_i32 = arith.constant 1 : i32
    %5 = arith.select %4, %c1_i32, %c16_i32 : i32
    %6 = vector.broadcast %5 : i32 to vector<32x1xi32>
    %7 = arith.remsi %3, %6 : vector<32x1xi32>
    %c0_i32_1 = arith.constant 0 : i32
    %8 = vector.broadcast %c0_i32_1 : i32 to vector<32x1xi32>
    %9 = arith.cmpi ne, %7, %8 : vector<32x1xi32>
    %c0_i32_2 = arith.constant 0 : i32
    %10 = vector.broadcast %c0_i32_2 : i32 to vector<32x1xi32>
    %11 = arith.cmpi slt, %7, %10 : vector<32x1xi32>
    %c0_i32_3 = arith.constant 0 : i32
    %12 = arith.cmpi slt, %5, %c0_i32_3 : i32
    %13 = vector.broadcast %12 : i1 to vector<32x1xi1>
    %14 = vector.broadcast %13 : vector<32x1xi1> to vector<32x1xi1>
    %15 = arith.xori %11, %14 : vector<32x1xi1>
    %16 = arith.andi %15, %9 : vector<32x1xi1>
    %17 = vector.broadcast %5 : i32 to vector<32x1xi32>
    %18 = arith.addi %7, %17 : vector<32x1xi32>
    %19 = arith.select %16, %18, %7 : vector<32x1xi1>, vector<32x1xi32>
    %20 = vector.extract_strided_slice %2 {offsets = [0, 0], sizes = [32, 128], strides = [1, 1]} : vector<34x128xf32> to vector<32x128xf32>
    %c0_i32_4 = arith.constant 0 : i32
    %21 = vector.broadcast %c0_i32_4 : i32 to vector<32x1xi32>
    %22 = arith.cmpi ne, %19, %21 : vector<32x1xi32>
    %23 = arith.extui %22 : vector<32x1xi1> to vector<32x1xi32>
    %24 = arith.sitofp %23 : vector<32x1xi32> to vector<32x1xf32>
    %25 = vector.broadcast %24 : vector<32x1xf32> to vector<32x128xf32>
    %26 = arith.mulf %20, %25 : vector<32x128xf32>
    %27 = arith.truncf %26 : vector<32x128xf32> to vector<32x128xbf16>
    %c0_5 = arith.constant 0 : index
    %c0_6 = arith.constant 0 : index
    %c0_7 = arith.constant 0 : index
    %28 = vector.load %arg2[%c0_5, %c0_6, %c0_7] : memref<3x128x128xbf16, #tpu.memory_space<vmem>>, vector<1x128x128xbf16>
    %29 = vector.shape_cast %28 : vector<1x128x128xbf16> to vector<128x128xbf16>
    %cst_8 = arith.constant dense<0.000000e+00> : vector<32x128xf32>
    %30 = tpu.matmul %27, %29, %cst_8 {dimension_numbers = #tpu.dot_dimension_numbers<[1], [0], [0], [1], [0, 0, 1, 1], [], []>} : vector<32x128xbf16>, vector<128x128xbf16>, vector<32x128xf32> -> vector<32x128xf32>
    %31 = vector.extract_strided_slice %2 {offsets = [1, 0], sizes = [32, 128], strides = [1, 1]} : vector<34x128xf32> to vector<32x128xf32>
    %32 = arith.truncf %31 : vector<32x128xf32> to vector<32x128xbf16>
    %c1 = arith.constant 1 : index
    %c0_9 = arith.constant 0 : index
    %c0_10 = arith.constant 0 : index
    %33 = vector.load %arg2[%c1, %c0_9, %c0_10] : memref<3x128x128xbf16, #tpu.memory_space<vmem>>, vector<1x128x128xbf16>
    %34 = vector.shape_cast %33 : vector<1x128x128xbf16> to vector<128x128xbf16>
    %cst_11 = arith.constant dense<0.000000e+00> : vector<32x128xf32>
    %35 = tpu.matmul %32, %34, %cst_11 {dimension_numbers = #tpu.dot_dimension_numbers<[1], [0], [0], [1], [0, 0, 1, 1], [], []>} : vector<32x128xbf16>, vector<128x128xbf16>, vector<32x128xf32> -> vector<32x128xf32>
    %36 = arith.addf %30, %35 : vector<32x128xf32>
    %37 = vector.extract_strided_slice %2 {offsets = [2, 0], sizes = [32, 128], strides = [1, 1]} : vector<34x128xf32> to vector<32x128xf32>
    %c15_i32 = arith.constant 15 : i32
    %38 = vector.broadcast %c15_i32 : i32 to vector<32x1xi32>
    %39 = arith.cmpi ne, %19, %38 : vector<32x1xi32>
    %40 = arith.extui %39 : vector<32x1xi1> to vector<32x1xi32>
    %41 = arith.sitofp %40 : vector<32x1xi32> to vector<32x1xf32>
    %42 = vector.broadcast %41 : vector<32x1xf32> to vector<32x128xf32>
    %43 = arith.mulf %37, %42 : vector<32x128xf32>
    %44 = arith.truncf %43 : vector<32x128xf32> to vector<32x128xbf16>
    %c2 = arith.constant 2 : index
    %c0_12 = arith.constant 0 : index
    %c0_13 = arith.constant 0 : index
    %45 = vector.load %arg2[%c2, %c0_12, %c0_13] : memref<3x128x128xbf16, #tpu.memory_space<vmem>>, vector<1x128x128xbf16>
    %46 = vector.shape_cast %45 : vector<1x128x128xbf16> to vector<128x128xbf16>
    %cst_14 = arith.constant dense<0.000000e+00> : vector<32x128xf32>
    %47 = tpu.matmul %44, %46, %cst_14 {dimension_numbers = #tpu.dot_dimension_numbers<[1], [0], [0], [1], [0, 0, 1, 1], [], []>} : vector<32x128xbf16>, vector<128x128xbf16>, vector<32x128xf32> -> vector<32x128xf32>
    %48 = arith.addf %36, %47 : vector<32x128xf32>
    %c0_15 = arith.constant 0 : index
    %c0_16 = arith.constant 0 : index
    %49 = vector.load %arg3[%c0_15, %c0_16] : memref<1x128xf32, #tpu.memory_space<vmem>>, vector<1x128xf32>
    %50 = vector.broadcast %49 : vector<1x128xf32> to vector<32x128xf32>
    %51 = arith.addf %48, %50 : vector<32x128xf32>
    %c0_17 = arith.constant 0 : index
    %c0_18 = arith.constant 0 : index
    %52 = vector.load %arg4[%c0_17, %c0_18] : memref<32x128xf32, #tpu.memory_space<vmem>>, vector<32x128xf32>
    tpu.vector_store %arg4[%c0_17, %c0_18], %51 {strides = array<i32>} : memref<32x128xf32, #tpu.memory_space<vmem>>, vector<32x128xf32>,
    %cst_19 = arith.constant dense<0.000000e+00> : vector<128xf32>
    %53 = vector.multi_reduction <add>, %51, %cst_19 [0] : vector<32x128xf32> to vector<128xf32>
    %54 = vector.shape_cast %53 : vector<128xf32> to vector<1x128xf32>
    %55 = arith.mulf %51, %51 : vector<32x128xf32>
    %cst_20 = arith.constant dense<0.000000e+00> : vector<128xf32>
    %56 = vector.multi_reduction <add>, %55, %cst_20 [0] : vector<32x128xf32> to vector<128xf32>
    %57 = vector.shape_cast %56 : vector<128xf32> to vector<1x128xf32>
    %58 = tpu.concatenate %54, %57 in 0 : vector<1x128xf32>, vector<1x128xf32> -> vector<2x128xf32>
    %59 = vector.shape_cast %58 : vector<2x128xf32> to vector<1x2x128xf32>
    %c0_21 = arith.constant 0 : index
    %c0_22 = arith.constant 0 : index
    %c0_23 = arith.constant 0 : index
    %60 = vector.load %arg5[%c0_21, %c0_22, %c0_23] : memref<1x2x128xf32, #tpu.memory_space<vmem>>, vector<1x2x128xf32>
    tpu.vector_store %arg5[%c0_21, %c0_22, %c0_23], %59 {strides = array<i32>} : memref<1x2x128xf32, #tpu.memory_space<vmem>>, vector<1x2x128xf32>,
    return
  }
  func.func @transform_0(%arg0: i32) -> (i32, i32) {
    %c0_i32 = arith.constant 0 : i32
    %c0_i32_0 = arith.constant 0 : i32
    return %arg0, %c0_i32 : i32, i32
  }
  func.func @transform_1(%arg0: i32) -> (i32, i32, i32) {
    %c0_i32 = arith.constant 0 : i32
    %c0_i32_0 = arith.constant 0 : i32
    %c0_i32_1 = arith.constant 0 : i32
    %c0_i32_2 = arith.constant 0 : i32
    return %c0_i32, %c0_i32_0, %c0_i32_1 : i32, i32, i32
  }
  func.func @transform_2(%arg0: i32) -> (i32, i32) {
    %c0_i32 = arith.constant 0 : i32
    %c0_i32_0 = arith.constant 0 : i32
    %c0_i32_1 = arith.constant 0 : i32
    return %c0_i32, %c0_i32_0 : i32, i32
  }
  func.func @transform_3(%arg0: i32) -> (i32, i32) {
    %c0_i32 = arith.constant 0 : i32
    %c0_i32_0 = arith.constant 0 : i32
    return %arg0, %c0_i32 : i32, i32
  }
  func.func @transform_4(%arg0: i32) -> (i32, i32, i32) {
    %c0_i32 = arith.constant 0 : i32
    %c0_i32_0 = arith.constant 0 : i32
    %c0_i32_1 = arith.constant 0 : i32
    return %arg0, %c0_i32, %c0_i32_0 : i32, i32, i32
  }
}

module attributes {stable_mosaic.version = 11 : i64} {
  func.func @_conv_transpose_kernel(%arg0: i32, %arg1: memref<16x64xf32, #tpu.memory_space<vmem>>, %arg2: memref<64x128xbf16, #tpu.memory_space<vmem>>, %arg3: memref<64x128xbf16, #tpu.memory_space<vmem>>, %arg4: memref<1x128xf32, #tpu.memory_space<vmem>>, %arg5: memref<32x128xf32, #tpu.memory_space<vmem>>) attributes {dimension_semantics = [#tpu.dimension_semantics<parallel>], iteration_bounds = array<i64: 1>, scalar_prefetch = 0 : i64, scratch_operands = 0 : i64, tpu.core_type = #tpu.core_type<tc>, window_params = [{transform_indices = @transform_0, window_bounds = array<i64: 16, 64>}, {pipeline_mode = #tpu.pipeline_mode<synchronous>, transform_indices = @transform_1, window_bounds = array<i64: 64, 128>}, {pipeline_mode = #tpu.pipeline_mode<synchronous>, transform_indices = @transform_2, window_bounds = array<i64: 64, 128>}, {pipeline_mode = #tpu.pipeline_mode<synchronous>, transform_indices = @transform_3, window_bounds = array<i64: 1, 128>}, {transform_indices = @transform_4, window_bounds = array<i64: 32, 128>}]} {
    %c0 = arith.constant 0 : index
    %c0_0 = arith.constant 0 : index
    %0 = vector.load %arg1[%c0, %c0_0] : memref<16x64xf32, #tpu.memory_space<vmem>>, vector<16x64xf32>
    %1 = arith.truncf %0 : vector<16x64xf32> to vector<16x64xbf16>
    %c0_1 = arith.constant 0 : index
    %c0_2 = arith.constant 0 : index
    %2 = vector.load %arg2[%c0_1, %c0_2] : memref<64x128xbf16, #tpu.memory_space<vmem>>, vector<64x128xbf16>
    %cst = arith.constant dense<0.000000e+00> : vector<16x128xf32>
    %3 = tpu.matmul %1, %2, %cst {dimension_numbers = #tpu.dot_dimension_numbers<[1], [0], [0], [1], [0, 0, 1, 1], [], []>} : vector<16x64xbf16>, vector<64x128xbf16>, vector<16x128xf32> -> vector<16x128xf32>
    %c0_3 = arith.constant 0 : index
    %c0_4 = arith.constant 0 : index
    %4 = vector.load %arg4[%c0_3, %c0_4] : memref<1x128xf32, #tpu.memory_space<vmem>>, vector<1x128xf32>
    %5 = vector.broadcast %4 : vector<1x128xf32> to vector<16x128xf32>
    %6 = arith.addf %3, %5 : vector<16x128xf32>
    %c0_5 = arith.constant 0 : index
    %c0_6 = arith.constant 0 : index
    %7 = vector.load %arg3[%c0_5, %c0_6] : memref<64x128xbf16, #tpu.memory_space<vmem>>, vector<64x128xbf16>
    %cst_7 = arith.constant dense<0.000000e+00> : vector<16x128xf32>
    %8 = tpu.matmul %1, %7, %cst_7 {dimension_numbers = #tpu.dot_dimension_numbers<[1], [0], [0], [1], [0, 0, 1, 1], [], []>} : vector<16x64xbf16>, vector<64x128xbf16>, vector<16x128xf32> -> vector<16x128xf32>
    %c0_8 = arith.constant 0 : index
    %c0_9 = arith.constant 0 : index
    %9 = vector.load %arg4[%c0_8, %c0_9] : memref<1x128xf32, #tpu.memory_space<vmem>>, vector<1x128xf32>
    %10 = vector.broadcast %9 : vector<1x128xf32> to vector<16x128xf32>
    %11 = arith.addf %8, %10 : vector<16x128xf32>
    %12 = vector.shape_cast %6 : vector<16x128xf32> to vector<16x1x128xf32>
    %13 = vector.shape_cast %11 : vector<16x128xf32> to vector<16x1x128xf32>
    %14 = tpu.concatenate %12, %13 in 1 : vector<16x1x128xf32>, vector<16x1x128xf32> -> vector<16x2x128xf32>
    %15 = vector.shape_cast %14 : vector<16x2x128xf32> to vector<32x128xf32>
    %c0_10 = arith.constant 0 : index
    %c0_11 = arith.constant 0 : index
    %16 = vector.load %arg5[%c0_10, %c0_11] : memref<32x128xf32, #tpu.memory_space<vmem>>, vector<32x128xf32>
    tpu.vector_store %arg5[%c0_10, %c0_11], %15 {strides = array<i32>} : memref<32x128xf32, #tpu.memory_space<vmem>>, vector<32x128xf32>,
    return
  }
  func.func @transform_0(%arg0: i32) -> (i32, i32) {
    %c0_i32 = arith.constant 0 : i32
    %c0_i32_0 = arith.constant 0 : i32
    return %arg0, %c0_i32 : i32, i32
  }
  func.func @transform_1(%arg0: i32) -> (i32, i32) {
    %c0_i32 = arith.constant 0 : i32
    %c0_i32_0 = arith.constant 0 : i32
    %c0_i32_1 = arith.constant 0 : i32
    return %c0_i32, %c0_i32_0 : i32, i32
  }
  func.func @transform_2(%arg0: i32) -> (i32, i32) {
    %c0_i32 = arith.constant 0 : i32
    %c0_i32_0 = arith.constant 0 : i32
    %c0_i32_1 = arith.constant 0 : i32
    return %c0_i32, %c0_i32_0 : i32, i32
  }
  func.func @transform_3(%arg0: i32) -> (i32, i32) {
    %c0_i32 = arith.constant 0 : i32
    %c0_i32_0 = arith.constant 0 : i32
    %c0_i32_1 = arith.constant 0 : i32
    return %c0_i32, %c0_i32_0 : i32, i32
  }
  func.func @transform_4(%arg0: i32) -> (i32, i32) {
    %c0_i32 = arith.constant 0 : i32
    %c0_i32_0 = arith.constant 0 : i32
    return %arg0, %c0_i32 : i32, i32
  }
}

module attributes {stable_mosaic.version = 11 : i64} {
  func.func @_bn_gelu_residual_kernel(%arg0: i32, %arg1: memref<32x128xf32, #tpu.memory_space<vmem>>, %arg2: memref<1x128xf32, #tpu.memory_space<vmem>>, %arg3: memref<1x128xf32, #tpu.memory_space<vmem>>, %arg4: memref<32x128xf32, #tpu.memory_space<vmem>>, %arg5: memref<32x128xf32, #tpu.memory_space<vmem>>) attributes {dimension_semantics = [#tpu.dimension_semantics<parallel>], iteration_bounds = array<i64: 1>, scalar_prefetch = 0 : i64, scratch_operands = 0 : i64, tpu.core_type = #tpu.core_type<tc>, window_params = [{transform_indices = @transform_0, window_bounds = array<i64: 32, 128>}, {pipeline_mode = #tpu.pipeline_mode<synchronous>, transform_indices = @transform_1, window_bounds = array<i64: 1, 128>}, {pipeline_mode = #tpu.pipeline_mode<synchronous>, transform_indices = @transform_2, window_bounds = array<i64: 1, 128>}, {transform_indices = @transform_3, window_bounds = array<i64: 32, 128>}, {transform_indices = @transform_4, window_bounds = array<i64: 32, 128>}]} {
    %c0 = arith.constant 0 : index
    %c0_0 = arith.constant 0 : index
    %0 = vector.load %arg1[%c0, %c0_0] : memref<32x128xf32, #tpu.memory_space<vmem>>, vector<32x128xf32>
    %c0_1 = arith.constant 0 : index
    %c0_2 = arith.constant 0 : index
    %1 = vector.load %arg2[%c0_1, %c0_2] : memref<1x128xf32, #tpu.memory_space<vmem>>, vector<1x128xf32>
    %2 = vector.broadcast %1 : vector<1x128xf32> to vector<32x128xf32>
    %3 = arith.mulf %0, %2 : vector<32x128xf32>
    %c0_3 = arith.constant 0 : index
    %c0_4 = arith.constant 0 : index
    %4 = vector.load %arg3[%c0_3, %c0_4] : memref<1x128xf32, #tpu.memory_space<vmem>>, vector<1x128xf32>
    %5 = vector.broadcast %4 : vector<1x128xf32> to vector<32x128xf32>
    %6 = arith.addf %3, %5 : vector<32x128xf32>
    %cst = arith.constant 5.000000e-01 : f32
    %7 = vector.broadcast %cst : f32 to vector<32x128xf32>
    %8 = arith.mulf %7, %6 : vector<32x128xf32>
    %cst_5 = arith.constant 4.471500e-02 : f32
    %9 = vector.broadcast %cst_5 : f32 to vector<32x128xf32>
    %10 = arith.mulf %9, %6 : vector<32x128xf32>
    %11 = arith.mulf %10, %6 : vector<32x128xf32>
    %12 = arith.mulf %11, %6 : vector<32x128xf32>
    %13 = arith.addf %6, %12 : vector<32x128xf32>
    %cst_6 = arith.constant 0.797884583 : f32
    %14 = vector.broadcast %cst_6 : f32 to vector<32x128xf32>
    %15 = arith.mulf %14, %13 : vector<32x128xf32>
    %16 = math.tanh %15 : vector<32x128xf32>
    %cst_7 = arith.constant 1.000000e+00 : f32
    %17 = vector.broadcast %cst_7 : f32 to vector<32x128xf32>
    %18 = arith.addf %17, %16 : vector<32x128xf32>
    %19 = arith.mulf %8, %18 : vector<32x128xf32>
    %c0_8 = arith.constant 0 : index
    %c0_9 = arith.constant 0 : index
    %20 = vector.load %arg4[%c0_8, %c0_9] : memref<32x128xf32, #tpu.memory_space<vmem>>, vector<32x128xf32>
    %21 = arith.addf %20, %19 : vector<32x128xf32>
    %cst_10 = arith.constant 0.70721358 : f32
    %22 = vector.broadcast %cst_10 : f32 to vector<32x128xf32>
    %23 = arith.mulf %21, %22 : vector<32x128xf32>
    %c0_11 = arith.constant 0 : index
    %c0_12 = arith.constant 0 : index
    %24 = vector.load %arg5[%c0_11, %c0_12] : memref<32x128xf32, #tpu.memory_space<vmem>>, vector<32x128xf32>
    tpu.vector_store %arg5[%c0_11, %c0_12], %23 {strides = array<i32>} : memref<32x128xf32, #tpu.memory_space<vmem>>, vector<32x128xf32>,
    return
  }
  func.func @transform_0(%arg0: i32) -> (i32, i32) {
    %c0_i32 = arith.constant 0 : i32
    %c0_i32_0 = arith.constant 0 : i32
    return %arg0, %c0_i32 : i32, i32
  }
  func.func @transform_1(%arg0: i32) -> (i32, i32) {
    %c0_i32 = arith.constant 0 : i32
    %c0_i32_0 = arith.constant 0 : i32
    %c0_i32_1 = arith.constant 0 : i32
    return %c0_i32, %c0_i32_0 : i32, i32
  }
  func.func @transform_2(%arg0: i32) -> (i32, i32) {
    %c0_i32 = arith.constant 0 : i32
    %c0_i32_0 = arith.constant 0 : i32
    %c0_i32_1 = arith.constant 0 : i32
    return %c0_i32, %c0_i32_0 : i32, i32
  }
  func.func @transform_3(%arg0: i32) -> (i32, i32) {
    %c0_i32 = arith.constant 0 : i32
    %c0_i32_0 = arith.constant 0 : i32
    return %arg0, %c0_i32 : i32, i32
  }
  func.func @transform_4(%arg0: i32) -> (i32, i32) {
    %c0_i32 = arith.constant 0 : i32
    %c0_i32_0 = arith.constant 0 : i32
    return %arg0, %c0_i32 : i32, i32
  }
}

module attributes {stable_mosaic.version = 11 : i64} {
  func.func @_bn_gelu_conv3x3_kernel(%arg0: i32, %arg1: memref<32x128xf32, #tpu.memory_space<vmem>>, %arg2: memref<1x128xf32, #tpu.memory_space<vmem>>, %arg3: memref<1x128xf32, #tpu.memory_space<vmem>>, %arg4: memref<3x128x128xbf16, #tpu.memory_space<vmem>>, %arg5: memref<1x128xf32, #tpu.memory_space<vmem>>, %arg6: memref<32x128xf32, #tpu.memory_space<vmem>>, %arg7: memref<1x2x128xf32, #tpu.memory_space<vmem>>) attributes {dimension_semantics = [#tpu.dimension_semantics<parallel>], iteration_bounds = array<i64: 1>, scalar_prefetch = 0 : i64, scratch_operands = 0 : i64, tpu.core_type = #tpu.core_type<tc>, window_params = [{transform_indices = @transform_0, window_bounds = array<i64: 32, 128>}, {pipeline_mode = #tpu.pipeline_mode<synchronous>, transform_indices = @transform_1, window_bounds = array<i64: 1, 128>}, {pipeline_mode = #tpu.pipeline_mode<synchronous>, transform_indices = @transform_2, window_bounds = array<i64: 1, 128>}, {pipeline_mode = #tpu.pipeline_mode<synchronous>, transform_indices = @transform_3, window_bounds = array<i64: 3, 128, 128>}, {pipeline_mode = #tpu.pipeline_mode<synchronous>, transform_indices = @transform_4, window_bounds = array<i64: 1, 128>}, {transform_indices = @transform_5, window_bounds = array<i64: 32, 128>}, {transform_indices = @transform_6, window_bounds = array<i64: 1, 2, 128>}]} {
    %c0 = arith.constant 0 : index
    %c0_0 = arith.constant 0 : index
    %0 = vector.load %arg1[%c0, %c0_0] : memref<32x128xf32, #tpu.memory_space<vmem>>, vector<32x128xf32>
    %c0_1 = arith.constant 0 : index
    %c0_2 = arith.constant 0 : index
    %1 = vector.load %arg2[%c0_1, %c0_2] : memref<1x128xf32, #tpu.memory_space<vmem>>, vector<1x128xf32>
    %2 = vector.broadcast %1 : vector<1x128xf32> to vector<32x128xf32>
    %3 = arith.mulf %0, %2 : vector<32x128xf32>
    %c0_3 = arith.constant 0 : index
    %c0_4 = arith.constant 0 : index
    %4 = vector.load %arg3[%c0_3, %c0_4] : memref<1x128xf32, #tpu.memory_space<vmem>>, vector<1x128xf32>
    %5 = vector.broadcast %4 : vector<1x128xf32> to vector<32x128xf32>
    %6 = arith.addf %3, %5 : vector<32x128xf32>
    %cst = arith.constant 5.000000e-01 : f32
    %7 = vector.broadcast %cst : f32 to vector<32x128xf32>
    %8 = arith.mulf %7, %6 : vector<32x128xf32>
    %cst_5 = arith.constant 4.471500e-02 : f32
    %9 = vector.broadcast %cst_5 : f32 to vector<32x128xf32>
    %10 = arith.mulf %9, %6 : vector<32x128xf32>
    %11 = arith.mulf %10, %6 : vector<32x128xf32>
    %12 = arith.mulf %11, %6 : vector<32x128xf32>
    %13 = arith.addf %6, %12 : vector<32x128xf32>
    %cst_6 = arith.constant 0.797884583 : f32
    %14 = vector.broadcast %cst_6 : f32 to vector<32x128xf32>
    %15 = arith.mulf %14, %13 : vector<32x128xf32>
    %16 = math.tanh %15 : vector<32x128xf32>
    %cst_7 = arith.constant 1.000000e+00 : f32
    %17 = vector.broadcast %cst_7 : f32 to vector<32x128xf32>
    %18 = arith.addf %17, %16 : vector<32x128xf32>
    %19 = arith.mulf %8, %18 : vector<32x128xf32>
    %cst_8 = arith.constant 0.000000e+00 : f32
    %20 = vector.broadcast %cst_8 : f32 to vector<1x128xf32>
    %21 = tpu.concatenate %20, %19, %20 in 0 : vector<1x128xf32>, vector<32x128xf32>, vector<1x128xf32> -> vector<34x128xf32>
    %22 = tpu.iota {dimensions = array<i32: 0>} : vector<32x1xi32>
    %c16_i32 = arith.constant 16 : i32
    %c0_i32 = arith.constant 0 : i32
    %23 = arith.cmpi eq, %c16_i32, %c0_i32 : i32
    %c1_i32 = arith.constant 1 : i32
    %24 = arith.select %23, %c1_i32, %c16_i32 : i32
    %25 = vector.broadcast %24 : i32 to vector<32x1xi32>
    %26 = arith.remsi %22, %25 : vector<32x1xi32>
    %c0_i32_9 = arith.constant 0 : i32
    %27 = vector.broadcast %c0_i32_9 : i32 to vector<32x1xi32>
    %28 = arith.cmpi ne, %26, %27 : vector<32x1xi32>
    %c0_i32_10 = arith.constant 0 : i32
    %29 = vector.broadcast %c0_i32_10 : i32 to vector<32x1xi32>
    %30 = arith.cmpi slt, %26, %29 : vector<32x1xi32>
    %c0_i32_11 = arith.constant 0 : i32
    %31 = arith.cmpi slt, %24, %c0_i32_11 : i32
    %32 = vector.broadcast %31 : i1 to vector<32x1xi1>
    %33 = vector.broadcast %32 : vector<32x1xi1> to vector<32x1xi1>
    %34 = arith.xori %30, %33 : vector<32x1xi1>
    %35 = arith.andi %34, %28 : vector<32x1xi1>
    %36 = vector.broadcast %24 : i32 to vector<32x1xi32>
    %37 = arith.addi %26, %36 : vector<32x1xi32>
    %38 = arith.select %35, %37, %26 : vector<32x1xi1>, vector<32x1xi32>
    %39 = vector.extract_strided_slice %21 {offsets = [0, 0], sizes = [32, 128], strides = [1, 1]} : vector<34x128xf32> to vector<32x128xf32>
    %c0_i32_12 = arith.constant 0 : i32
    %40 = vector.broadcast %c0_i32_12 : i32 to vector<32x1xi32>
    %41 = arith.cmpi ne, %38, %40 : vector<32x1xi32>
    %42 = arith.extui %41 : vector<32x1xi1> to vector<32x1xi32>
    %43 = arith.sitofp %42 : vector<32x1xi32> to vector<32x1xf32>
    %44 = vector.broadcast %43 : vector<32x1xf32> to vector<32x128xf32>
    %45 = arith.mulf %39, %44 : vector<32x128xf32>
    %46 = arith.truncf %45 : vector<32x128xf32> to vector<32x128xbf16>
    %c0_13 = arith.constant 0 : index
    %c0_14 = arith.constant 0 : index
    %c0_15 = arith.constant 0 : index
    %47 = vector.load %arg4[%c0_13, %c0_14, %c0_15] : memref<3x128x128xbf16, #tpu.memory_space<vmem>>, vector<1x128x128xbf16>
    %48 = vector.shape_cast %47 : vector<1x128x128xbf16> to vector<128x128xbf16>
    %cst_16 = arith.constant dense<0.000000e+00> : vector<32x128xf32>
    %49 = tpu.matmul %46, %48, %cst_16 {dimension_numbers = #tpu.dot_dimension_numbers<[1], [0], [0], [1], [0, 0, 1, 1], [], []>} : vector<32x128xbf16>, vector<128x128xbf16>, vector<32x128xf32> -> vector<32x128xf32>
    %50 = vector.extract_strided_slice %21 {offsets = [1, 0], sizes = [32, 128], strides = [1, 1]} : vector<34x128xf32> to vector<32x128xf32>
    %51 = arith.truncf %50 : vector<32x128xf32> to vector<32x128xbf16>
    %c1 = arith.constant 1 : index
    %c0_17 = arith.constant 0 : index
    %c0_18 = arith.constant 0 : index
    %52 = vector.load %arg4[%c1, %c0_17, %c0_18] : memref<3x128x128xbf16, #tpu.memory_space<vmem>>, vector<1x128x128xbf16>
    %53 = vector.shape_cast %52 : vector<1x128x128xbf16> to vector<128x128xbf16>
    %cst_19 = arith.constant dense<0.000000e+00> : vector<32x128xf32>
    %54 = tpu.matmul %51, %53, %cst_19 {dimension_numbers = #tpu.dot_dimension_numbers<[1], [0], [0], [1], [0, 0, 1, 1], [], []>} : vector<32x128xbf16>, vector<128x128xbf16>, vector<32x128xf32> -> vector<32x128xf32>
    %55 = arith.addf %49, %54 : vector<32x128xf32>
    %56 = vector.extract_strided_slice %21 {offsets = [2, 0], sizes = [32, 128], strides = [1, 1]} : vector<34x128xf32> to vector<32x128xf32>
    %c15_i32 = arith.constant 15 : i32
    %57 = vector.broadcast %c15_i32 : i32 to vector<32x1xi32>
    %58 = arith.cmpi ne, %38, %57 : vector<32x1xi32>
    %59 = arith.extui %58 : vector<32x1xi1> to vector<32x1xi32>
    %60 = arith.sitofp %59 : vector<32x1xi32> to vector<32x1xf32>
    %61 = vector.broadcast %60 : vector<32x1xf32> to vector<32x128xf32>
    %62 = arith.mulf %56, %61 : vector<32x128xf32>
    %63 = arith.truncf %62 : vector<32x128xf32> to vector<32x128xbf16>
    %c2 = arith.constant 2 : index
    %c0_20 = arith.constant 0 : index
    %c0_21 = arith.constant 0 : index
    %64 = vector.load %arg4[%c2, %c0_20, %c0_21] : memref<3x128x128xbf16, #tpu.memory_space<vmem>>, vector<1x128x128xbf16>
    %65 = vector.shape_cast %64 : vector<1x128x128xbf16> to vector<128x128xbf16>
    %cst_22 = arith.constant dense<0.000000e+00> : vector<32x128xf32>
    %66 = tpu.matmul %63, %65, %cst_22 {dimension_numbers = #tpu.dot_dimension_numbers<[1], [0], [0], [1], [0, 0, 1, 1], [], []>} : vector<32x128xbf16>, vector<128x128xbf16>, vector<32x128xf32> -> vector<32x128xf32>
    %67 = arith.addf %55, %66 : vector<32x128xf32>
    %c0_23 = arith.constant 0 : index
    %c0_24 = arith.constant 0 : index
    %68 = vector.load %arg5[%c0_23, %c0_24] : memref<1x128xf32, #tpu.memory_space<vmem>>, vector<1x128xf32>
    %69 = vector.broadcast %68 : vector<1x128xf32> to vector<32x128xf32>
    %70 = arith.addf %67, %69 : vector<32x128xf32>
    %c0_25 = arith.constant 0 : index
    %c0_26 = arith.constant 0 : index
    %71 = vector.load %arg6[%c0_25, %c0_26] : memref<32x128xf32, #tpu.memory_space<vmem>>, vector<32x128xf32>
    tpu.vector_store %arg6[%c0_25, %c0_26], %70 {strides = array<i32>} : memref<32x128xf32, #tpu.memory_space<vmem>>, vector<32x128xf32>,
    %cst_27 = arith.constant dense<0.000000e+00> : vector<128xf32>
    %72 = vector.multi_reduction <add>, %70, %cst_27 [0] : vector<32x128xf32> to vector<128xf32>
    %73 = vector.shape_cast %72 : vector<128xf32> to vector<1x128xf32>
    %74 = arith.mulf %70, %70 : vector<32x128xf32>
    %cst_28 = arith.constant dense<0.000000e+00> : vector<128xf32>
    %75 = vector.multi_reduction <add>, %74, %cst_28 [0] : vector<32x128xf32> to vector<128xf32>
    %76 = vector.shape_cast %75 : vector<128xf32> to vector<1x128xf32>
    %77 = tpu.concatenate %73, %76 in 0 : vector<1x128xf32>, vector<1x128xf32> -> vector<2x128xf32>
    %78 = vector.shape_cast %77 : vector<2x128xf32> to vector<1x2x128xf32>
    %c0_29 = arith.constant 0 : index
    %c0_30 = arith.constant 0 : index
    %c0_31 = arith.constant 0 : index
    %79 = vector.load %arg7[%c0_29, %c0_30, %c0_31] : memref<1x2x128xf32, #tpu.memory_space<vmem>>, vector<1x2x128xf32>
    tpu.vector_store %arg7[%c0_29, %c0_30, %c0_31], %78 {strides = array<i32>} : memref<1x2x128xf32, #tpu.memory_space<vmem>>, vector<1x2x128xf32>,
    return
  }
  func.func @transform_0(%arg0: i32) -> (i32, i32) {
    %c0_i32 = arith.constant 0 : i32
    %c0_i32_0 = arith.constant 0 : i32
    return %arg0, %c0_i32 : i32, i32
  }
  func.func @transform_1(%arg0: i32) -> (i32, i32) {
    %c0_i32 = arith.constant 0 : i32
    %c0_i32_0 = arith.constant 0 : i32
    %c0_i32_1 = arith.constant 0 : i32
    return %c0_i32, %c0_i32_0 : i32, i32
  }
  func.func @transform_2(%arg0: i32) -> (i32, i32) {
    %c0_i32 = arith.constant 0 : i32
    %c0_i32_0 = arith.constant 0 : i32
    %c0_i32_1 = arith.constant 0 : i32
    return %c0_i32, %c0_i32_0 : i32, i32
  }
  func.func @transform_3(%arg0: i32) -> (i32, i32, i32) {
    %c0_i32 = arith.constant 0 : i32
    %c0_i32_0 = arith.constant 0 : i32
    %c0_i32_1 = arith.constant 0 : i32
    %c0_i32_2 = arith.constant 0 : i32
    return %c0_i32, %c0_i32_0, %c0_i32_1 : i32, i32, i32
  }
  func.func @transform_4(%arg0: i32) -> (i32, i32) {
    %c0_i32 = arith.constant 0 : i32
    %c0_i32_0 = arith.constant 0 : i32
    %c0_i32_1 = arith.constant 0 : i32
    return %c0_i32, %c0_i32_0 : i32, i32
  }
  func.func @transform_5(%arg0: i32) -> (i32, i32) {
    %c0_i32 = arith.constant 0 : i32
    %c0_i32_0 = arith.constant 0 : i32
    return %arg0, %c0_i32 : i32, i32
  }
  func.func @transform_6(%arg0: i32) -> (i32, i32, i32) {
    %c0_i32 = arith.constant 0 : i32
    %c0_i32_0 = arith.constant 0 : i32
    %c0_i32_1 = arith.constant 0 : i32
    return %arg0, %c0_i32, %c0_i32_0 : i32, i32, i32
  }
}

</mosaic_0001>

<bundles_post_ra>
// kernel: tile.28
= control target key start
LH: loop header
LB: loop body
LE: loop exit
PB: predicated region body
PF: predicated region fallthrough
CT: control target
= control target key end

     0   :  { %s28_s0 = inlined_call_operand.vmem [shape: f32[8], index: 0, kind: input, shape index: {}]   ;;  %s29_s1 = inlined_call_operand.vmem [shape: f32[16,8], index: 1, kind: output, shape index: {}]  }
   0x1   :  { %v4_v0 = vld [vmem:[%s28_s0] ss:$0 sm:$0xff] }
   0x2   :  { %5 = vst [vmem:[%s29_s1] sm:$0xff] %v4_v0  ;;  %8 = vst [vmem:[%s29_s1 + $0x8] sm:$0xff] %v4_v0 }

// kernel: tile.29
= control target key start
LH: loop header
LB: loop body
LE: loop exit
PB: predicated region body
PF: predicated region fallthrough
CT: control target
= control target key end

     0   :  { %s131_s10 = smov 120   ;;  %s132_s11 = smov 104   ;;  %vm3_vm0 = vcmask 64512   ;;  %vm9_vm1 = vcmask 1048512   ;;  %vm15_vm2 = vcmask 982912   ;;  %vm21_vm3 = vcmask 917312   ;;  %s207_s0 = inlined_call_operand.vmem [shape: f32[16,8], index: 0, kind: input, shape index: {}]   ;;  %s208_s1 = inlined_call_operand.vmem [shape: f32[1,128], index: 1, kind: output, shape index: {}]  }
   0x1   :  { %v101_v0 = vld [vmem:[%s207_s0 + $0xf] sm:$0x1]   ;;  %v103_v1 = vld [vmem:[%s207_s0 + $0xd] sm:$0x1]   ;;  %v102_v2 = vld [vmem:[%s207_s0 + $0xe] sm:$0x1]  }
   0x2   :  { %7 = vrot.lane.b32.xlu0 %v101_v0, %s131_s10  ;;  %19 = vrot.lane.b32.xlu1 %v103_v1, %s132_s11  ;;  %v104_v3 = vld [vmem:[%s207_s0 + $0xc] sm:$0x1]   ;;  %s133_s16 = smov 112   ;;  %s134_s17 = smov 96   ;;  %v105_v4 = vld [vmem:[%s207_s0 + $0xb] sm:$0x1]  }
   0x3   :  { %v106_v5 = vld [vmem:[%s207_s0 + $0xa] sm:$0x1]   ;;  %v2_v6 = vld [vmem:[%s207_s0] sm:$0x1]   ;;  %s135_s24 = smov 88   ;;  %s136_s25 = smov 80  }
   0x4   :  { %4 = vst.msk [vmem:[#allocation0] sm:$0x1] %vm3_vm0, %v2_v6   ;;  %v107_v7 = vld [vmem:[%s207_s0 + $0x9] sm:$0x1]   ;;  %v108_v8 = vld [vmem:[%s207_s0 + $0x8] sm:$0x1]  }
   0x5   :  { %s137_s30 = smov 72   ;;  %s138_s2 = smov 64   ;;  %v109_v9 = vld [vmem:[%s207_s0 + $0x7] sm:$0x1]   ;;  %v110_v10 = vld [vmem:[%s207_s0 + $0x6] sm:$0x1]  }
   0x6   :  { %13 = vrot.lane.b32.xlu0 %v102_v2, %s133_s16  ;;  %25 = vrot.lane.b32.xlu1 %v104_v3, %s134_s17  ;;  %s139_s7 = smov 56   ;;  %s140_s8 = smov 48   ;;  %v111_v11 = vld [vmem:[%s207_s0 + $0x5] sm:$0x1]   ;;  %v112_v12 = vld [vmem:[%s207_s0 + $0x4] sm:$0x1]  }
   0x7   :  { %s141_s13 = smov 40   ;;  %s142_s14 = smov 32   ;;  %v113_v13 = vld [vmem:[%s207_s0 + $0x3] sm:$0x1]   ;;  %v114_v14 = vld [vmem:[%s207_s0 + $0x2] sm:$0x1]  }
   0x8   :  { %s143_s19 = smov 24   ;;  %s144_s20 = smov 16   ;;  %v115_v15 = vld [vmem:[%s207_s0 + $0x1] sm:$0x1]   ;;  %vm27_vm4 = vcmask 851712   ;;  %vm33_vm5 = vcmask 786112  }
   0x9   :  { %s145_s0 = smov 8   ;;  %vm39_vm6 = vcmask 720512   ;;  %vm45_vm7 = vcmask 654912   ;;  %vm51_vm8 = vcmask 589312   ;;  %vm57_vm9 = vcmask 523712  }
   0xa   :  { %31 = vrot.lane.b32.xlu0 %v105_v4, %s135_s24  ;;  %37 = vrot.lane.b32.xlu1 %v106_v5, %s136_s25  ;;  %vm63_vm10 = vcmask 458112   ;;  %vm69_vm11 = vcmask 392512   ;;  %vm75_vm12 = vcmask 326912   ;;  %vm81_vm13 = vcmask 261312  }
   0xb   :  { %vm87_vm14 = vcmask 195712   ;;  %vm93_vm15 = vcmask 130112  }
   0xe   :  { %43 = vrot.lane.b32.xlu0 %v107_v7, %s137_s30  ;;  %49 = vrot.lane.b32.xlu1 %v108_v8, %s138_s2 }
  0x12   :  { %55 = vrot.lane.b32.xlu0 %v109_v9, %s139_s7  ;;  %61 = vrot.lane.b32.xlu1 %v110_v10, %s140_s8 }
  0x16   :  { %67 = vrot.lane.b32.xlu0 %v111_v11, %s141_s13  ;;  %73 = vrot.lane.b32.xlu1 %v112_v12, %s142_s14 }
  0x1a   :  { %79 = vrot.lane.b32.xlu0 %v113_v13, %s143_s19  ;;  %85 = vrot.lane.b32.xlu1 %v114_v14, %s144_s20 }
  0x1e   :  { %91 = vrot.lane.b32.xlu0 %v115_v15, %s145_s0 }
  0x74   :  { %v8_v16 = vpop.permute.xlu0 %7   ;;  %v20_v17 = vpop.permute.xlu1 %19  }
  0x75   :  { %10 = vst.msk [vmem:[#allocation0] sm:$0x1] %vm9_vm1, %v8_v16  }
  0x78   :  { %v14_v18 = vpop.permute.xlu0 %13   ;;  %v26_v19 = vpop.permute.xlu1 %25  }
  0x79   :  { %16 = vst.msk [vmem:[#allocation0] sm:$0x1] %vm15_vm2, %v14_v18  }
  0x7a   :  { %22 = vst.msk [vmem:[#allocation0] sm:$0x1] %vm21_vm3, %v20_v17  }
  0x7b   :  { %28 = vst.msk [vmem:[#allocation0] sm:$0x1] %vm27_vm4, %v26_v19  }
  0x7c   :  { %v32_v20 = vpop.permute.xlu0 %31   ;;  %v38_v21 = vpop.permute.xlu1 %37  }
  0x7d   :  { %34 = vst.msk [vmem:[#allocation0] sm:$0x1] %vm33_vm5, %v32_v20  }
  0x7e   :  { %40 = vst.msk [vmem:[#allocation0] sm:$0x1] %vm39_vm6, %v38_v21  }
  0x80   :  { %v44_v22 = vpop.permute.xlu0 %43   ;;  %v50_v23 = vpop.permute.xlu1 %49  }
  0x81   :  { %46 = vst.msk [vmem:[#allocation0] sm:$0x1] %vm45_vm7, %v44_v22  }
  0x82   :  { %52 = vst.msk [vmem:[#allocation0] sm:$0x1] %vm51_vm8, %v50_v23  }
  0x84   :  { %v56_v24 = vpop.permute.xlu0 %55   ;;  %v62_v25 = vpop.permute.xlu1 %61  }
  0x85   :  { %58 = vst.msk [vmem:[#allocation0] sm:$0x1] %vm57_vm9, %v56_v24  }
  0x86   :  { %64 = vst.msk [vmem:[#allocation0] sm:$0x1] %vm63_vm10, %v62_v25  }
  0x88   :  { %v68_v26 = vpop.permute.xlu0 %67   ;;  %v74_v27 = vpop.permute.xlu1 %73  }
  0x89   :  { %70 = vst.msk [vmem:[#allocation0] sm:$0x1] %vm69_vm11, %v68_v26  }
  0x8a   :  { %76 = vst.msk [vmem:[#allocation0] sm:$0x1] %vm75_vm12, %v74_v27  }
  0x8c   :  { %v80_v28 = vpop.permute.xlu0 %79   ;;  %v86_v29 = vpop.permute.xlu1 %85  }
  0x8d   :  { %82 = vst.msk [vmem:[#allocation0] sm:$0x1] %vm81_vm13, %v80_v28  }
  0x8e   :  { %88 = vst.msk [vmem:[#allocation0] sm:$0x1] %vm87_vm14, %v86_v29  }
  0x90   :  { %v92_v30 = vpop.permute.xlu0 %91  }
  0x91   :  { %94 = vst.msk [vmem:[#allocation0] sm:$0x1] %vm93_vm15, %v92_v30  }
  0x98   :  { %v98_v31 = vld [vmem:[#allocation0] sm:$0x1] }
  0x99   :  { %100 = vst [vmem:[%s208_s1] sm:$0x1] %v98_v31 }

// kernel: up_block_forward.7
= control target key start
LH: loop header
LB: loop body
LE: loop exit
PB: predicated region body
PF: predicated region fallthrough
CT: control target
= control target key end

     0   :  { %s176_s0 = inlined_call_operand.vmem [shape: f32[32,128], index: 0, kind: input, shape index: {}]   ;;  %s177_s1 = inlined_call_operand.vmem [shape: f32[1,128], index: 1, kind: input, shape index: {}]   ;;  %s178_s2 = inlined_call_operand.vmem [shape: f32[1,128], index: 2, kind: input, shape index: {}]   ;;  %s179_s3 = inlined_call_operand.vmem [shape: f32[32,128], index: 3, kind: input, shape index: {}]   ;;  %s180_s4 = inlined_call_operand.vmem [shape: f32[32,128], index: 4, kind: output, shape index: {}]  }
   0x1   :  { %v17_v0 = vld [vmem:[%s176_s0] sm:$0xff]  ;;  %v18_v4 = vld [vmem:[%s176_s0 + $0x8] sm:$0xff]  ;;  %v19_v6 = vld [vmem:[%s176_s0 + $0x10] sm:$0xff] }
   0x2   :  { %v99_v1 = vld [vmem:[%s177_s1] ss:$0 sm:$0xff]  ;;  %v20_v7 = vld [vmem:[%s176_s0 + $0x18] sm:$0xff]  ;;  %v80_v46 = vld [vmem:[%s179_s3 + $0x8] sm:$0xff] }
   0x3   :  { %v100_v2 = vld [vmem:[%s178_s2] ss:$0 sm:$0xff]  ;;  %v28_v3 = vmul.f32 %v99_v1, %v17_v0  ;;  %v29_v5 = vmul.f32 %v99_v1, %v18_v4  ;;  %v30_v9 = vmul.f32 %v99_v1, %v19_v6  ;;  %v31_v10 = vmul.f32 %v99_v1, %v20_v7  ;;  %v81_v49 = vld [vmem:[%s179_s3 + $0x10] sm:$0xff]  ;;  %v82_v53 = vld [vmem:[%s179_s3 + $0x18] sm:$0xff] }
   0x4   :  { %v79_v41 = vld [vmem:[%s179_s3] sm:$0xff] }
   0x5   :  { %v39_v8 = vadd.f32 %v100_v2, %v28_v3  ;;  %v40_v11 = vadd.f32 %v100_v2, %v29_v5  ;;  %v41_v13 = vadd.f32 %v100_v2, %v30_v9  ;;  %v42_v14 = vadd.f32 %v100_v2, %v31_v10 }
   0x7   :  { %v47_v12 = vmul.f32 0.044715, %v39_v8  ;;  %v48_v15 = vmul.f32 0.044715, %v40_v11  ;;  %v49_v17 = vmul.f32 0.044715, %v41_v13 }
   0x8   :  { %v50_v19 = vmul.f32 0.044715, %v42_v14  ;;  %v43_v34 = vmul.f32 0.5, %v39_v8  ;;  %v44_v36 = vmul.f32 0.5, %v40_v11  ;;  %v45_v39 = vmul.f32 0.5, %v41_v13 }
   0x9   :  { %v51_v16 = vmul.f32 %v47_v12, %v39_v8  ;;  %v52_v18 = vmul.f32 %v48_v15, %v40_v11  ;;  %v53_v21 = vmul.f32 %v49_v17, %v41_v13  ;;  %v46_v43 = vmul.f32 0.5, %v42_v14 }
   0xa   :  { %v54_v23 = vmul.f32 %v50_v19, %v42_v14 }
   0xb   :  { %v55_v20 = vmul.f32 %v51_v16, %v39_v8  ;;  %v56_v22 = vmul.f32 %v52_v18, %v40_v11  ;;  %v57_v25 = vmul.f32 %v53_v21, %v41_v13 }
   0xc   :  { %v58_v27 = vmul.f32 %v54_v23, %v42_v14 }
   0xd   :  { %v59_v24 = vadd.f32 %v55_v20, %v39_v8  ;;  %v60_v26 = vadd.f32 %v56_v22, %v40_v11  ;;  %v61_v29 = vadd.f32 %v57_v25, %v41_v13 }
   0xe   :  { %v62_v31 = vadd.f32 %v58_v27, %v42_v14 }
   0xf   :  { %v63_v28 = vmul.f32 0.7978846, %v59_v24  ;;  %v64_v30 = vmul.f32 0.7978846, %v60_v26  ;;  %v65_v32 = vmul.f32 0.7978846, %v61_v29 }
  0x10   :  { %v66_v33 = vmul.f32 0.7978846, %v62_v31 }
  0x11   :  { %101 = vtanh.f32 %v63_v28 }
  0x12   :  { %103 = vtanh.f32 %v64_v30 }
  0x13   :  { %105 = vtanh.f32 %v65_v32 }
  0x14   :  { %107 = vtanh.f32 %v66_v33 }
  0x1b   :  { %v102_v35 = vpop.eup %101 }
  0x1c   :  { %v104_v37 = vpop.eup %103  ;;  %v71_v38 = vadd.f32 1.0, %v102_v35 }
  0x1d   :  { %v106_v40 = vpop.eup %105  ;;  %v72_v42 = vadd.f32 1.0, %v104_v37 }
  0x1e   :  { %v108_v44 = vpop.eup %107  ;;  %v75_v45 = vmul.f32 %v71_v38, %v43_v34  ;;  %v73_v47 = vadd.f32 1.0, %v106_v40 }
  0x1f   :  { %v76_v48 = vmul.f32 %v72_v42, %v44_v36  ;;  %v74_v50 = vadd.f32 1.0, %v108_v44 }
  0x20   :  { %v83_v51 = vadd.f32 %v79_v41, %v75_v45  ;;  %v77_v52 = vmul.f32 %v73_v47, %v45_v39 }
  0x21   :  { %v84_v54 = vadd.f32 %v80_v46, %v76_v48  ;;  %v78_v55 = vmul.f32 %v74_v50, %v46_v43 }
  0x22   :  { %v87_v56 = vmul.f32 0.7072136, %v83_v51  ;;  %v85_v57 = vadd.f32 %v81_v49, %v77_v52 }
  0x23   :  { %v88_v58 = vmul.f32 0.7072136, %v84_v54  ;;  %v86_v59 = vadd.f32 %v82_v53, %v78_v55 }
  0x24   :  { %91 = vst [vmem:[%s180_s4] sm:$0xff] %v87_v56  ;;  %v89_v60 = vmul.f32 0.7072136, %v85_v57 }
  0x25   :  { %92 = vst [vmem:[%s180_s4 + $0x8] sm:$0xff] %v88_v58  ;;  %v90_v61 = vmul.f32 0.7072136, %v86_v59 }
  0x26   :  { %93 = vst [vmem:[%s180_s4 + $0x10] sm:$0xff] %v89_v60 }
  0x27   :  { %94 = vst [vmem:[%s180_s4 + $0x18] sm:$0xff] %v90_v61 }

// kernel: up_block_forward.4
= control target key start
LH: loop header
LB: loop body
LE: loop exit
PB: predicated region body
PF: predicated region fallthrough
CT: control target
= control target key end

     0   :  { %9 = vsyncpa [#allocation3], 0  ;;  %s931_s0 = inlined_call_operand.vmem [shape: f32[16,64], index: 0, kind: input, shape index: {}]   ;;  %s932_s1 = inlined_call_operand.hbm [shape: bf16[64,128], index: 1, kind: input, shape index: {}]   ;;  %s933_s2 = inlined_call_operand.hbm [shape: bf16[64,128], index: 2, kind: input, shape index: {}]   ;;  %s934_s3 = inlined_call_operand.hbm [shape: f32[1,128], index: 3, kind: input, shape index: {}]   ;;  %s935_s4 = inlined_call_operand.vmem [shape: f32[32,128], index: 4, kind: output, shape index: {}]  }
   0x1   :  { %10 = vsyncpa [#allocation5], 0  ;;  %s760_s15 = smov [#allocation4]   ;;  %s761_s17 = smov [#allocation2]  }
   0x2   :  { %s30_s16 = sshll.u32 %s760_s15, 4  ;;  %s18_s18 = sshll.u32 %s761_s17, 4  ;;  %s31_s16 = int_to_ptr.vmem [resolvable:$true] %s30_s16  ;;  %s794_s18 = int_to_ptr.vmem [resolvable:$true] %s18_s18 }
   0x3   :  { %s690_s21 = scalar_lea.hbm %s933_s2, 512 }
   0x4   :  { %p691_p0 = scmp.ne.s32.totalorder %s933_s2, %s690_s21  ;;  %p694_p1 = scmp.lt.u32.totalorder %s690_s21, %s933_s2 }
   0x6   :  { %p696_p2 = pnand %p694_p1, %p691_p0 }
   0x8   :  { %699 = shalt.err (!%p696_p2)
}
   0x9   :  { %s700_s26 = scalar_lea.vmem %s31_s16, 512  ;;  %p705_p4 = scmp.lt.s32.totalorder %s31_s16, %s31_s16 }
   0xa   :  { %p701_p3 = scmp.ne.s32.totalorder %s31_s16, %s700_s26  ;;  %p706_p5 = scmp.lt.s32.totalorder %s700_s26, %s700_s26 }
   0xc   :  { %p707_p6 = por %p706_p5, %p705_p4 }
   0xe   :  { %p708_p7 = pnand %p707_p6, %p701_p3 }
  0x10   :  { %711 = shalt.err (!%p708_p7)
}
  0x11   :  { %s762_s27 = smov 64   ;;  %s763_s28 = smov 4  }
  0x12   :  { %36 = dma.hbm_to_vmem [thread:$0]  %s933_s2, 512, %s31_s16, [#allocation5], %s762_s27, %s762_s27, %s763_s28  }
  0x13   :  { %s712_s7 = scalar_lea.hbm %s932_s1, 512 }
  0x14   :  { %p713_p8 = scmp.ne.s32.totalorder %s932_s1, %s712_s7  ;;  %p716_p9 = scmp.lt.u32.totalorder %s712_s7, %s932_s1 }
  0x16   :  { %p718_p10 = pnand %p716_p9, %p713_p8 }
  0x18   :  { %721 = shalt.err (!%p718_p10)
}
  0x19   :  { %s722_s12 = scalar_lea.vmem %s794_s18, 512  ;;  %p727_p12 = scmp.lt.s32.totalorder %s794_s18, %s794_s18 }
  0x1a   :  { %p723_p11 = scmp.ne.s32.totalorder %s794_s18, %s722_s12  ;;  %p728_p13 = scmp.lt.s32.totalorder %s722_s12, %s722_s12 }
  0x1c   :  { %p729_p0 = por %p728_p13, %p727_p12 }
  0x1e   :  { %p730_p1 = pnand %p729_p0, %p723_p11 }
  0x20   :  { %733 = shalt.err (!%p730_p1)
}
  0x21   :  { %24 = dma.hbm_to_vmem [thread:$0]  %s932_s1, 512, %s794_s18, [#allocation3], %s762_s27, %s762_s27, %s763_s28  }
  0x22   :  { %s764_s14 = smov [#allocation6]   ;;  %s734_s19 = scalar_lea.hbm %s934_s3, 16 }
  0x23   :  { %s43_s15 = sshll.u32 %s764_s14, 4  ;;  %p735_p2 = scmp.ne.s32.totalorder %s934_s3, %s734_s19  ;;  %s44_s15 = int_to_ptr.vmem [resolvable:$true] %s43_s15 }
  0x24   :  { %p738_p3 = scmp.lt.u32.totalorder %s734_s19, %s934_s3 }
  0x26   :  { %p740_p4 = pnand %p738_p3, %p735_p2 }
  0x28   :  { %743 = shalt.err (!%p740_p4)
}
  0x29   :  { %s744_s24 = scalar_lea.vmem %s44_s15, 16  ;;  %s748_s1 = scalar_lea.vmem %s44_s15, 32 }
  0x2a   :  { %p745_p5 = scmp.ne.s32.totalorder %s44_s15, %s744_s24  ;;  %p749_p6 = scmp.lt.s32.totalorder %s44_s15, %s44_s15 }
  0x2b   :  { %p750_p7 = scmp.lt.s32.totalorder %s748_s1, %s744_s24 }
  0x2d   :  { %p751_p8 = por %p750_p7, %p749_p6 }
  0x2f   :  { %p752_p9 = pnand %p751_p8, %p745_p5 }
  0x31   :  { %755 = shalt.err (!%p752_p9)
}
  0x32   :  { %46 = dma.hbm_to_vmem [thread:$0]  %s934_s3, 16, %s44_s15, [#allocation5]  }
  0x33   :  { %756 = dma.done.wait [#allocation3], 512  }
  0x34   :  { %757 = vsyncadd [#allocation3], 4294966784 }
  0x35   :  { %758 = dma.done.wait [#allocation5], 528  }
  0x36   :  { %759 = vsyncadd [#allocation5], 4294966768  ;;  %v765_v0 = vmov 0.0   ;;  %vm766_vm0 = vmmov 0   ;;  %v682_v1 = vld [vmem:[#allocation2] sm:$0xff]   ;;  %v684_v3 = vld [vmem:[#allocation2 + $0x8] sm:$0xff]   ;;  %v223_v14 = vlaneseq }
  0x37   :  { %649 = vmatprep.subr.bf16.mxu0 %v765_v0  ;;  %661 = vmatprep.subr.bf16.mxu1 %v765_v0  ;;  %v683_v2 = vld [vmem:[#allocation4] sm:$0xff]   ;;  %v685_v4 = vld [vmem:[#allocation4 + $0x8] sm:$0xff]   ;;  %v686_v5 = vld [vmem:[#allocation2 + $0x10] sm:$0xff]   ;;  %vm99_vm1 = vcmask 523264   ;;  %v767_v12 = vmov 1966171168  }
  0x38   :  { %657 = vmatprep.mubr.msk.bf16.mxu0 %vm766_vm0, %v765_v0  ;;  %669 = vmatprep.mubr.msk.bf16.mxu1 %vm766_vm0, %v765_v0  ;;  %v687_v6 = vld [vmem:[#allocation4 + $0x10] sm:$0xff]   ;;  %v688_v7 = vld [vmem:[#allocation2 + $0x18] sm:$0xff]   ;;  %v57_v8 = vld [vmem:[%s931_s0] sm:$0xff]  ;;  %v221_v13 = vunpack.c.l.s4 %v767_v12  ;;  %v224_v16 = vshrl.u32 %v223_v14, 7  ;;  %v768_v17 = vmov 1983009808  }
  0x39   :  { %650 = vmatpush3.bf16.msra.mxu0 %v682_v1  ;;  %662 = vmatpush3.bf16.msra.mxu1 %v683_v2  ;;  %v58_v9 = vld [vmem:[%s931_s0 + $0x8] sm:$0xff]  ;;  %v689_v10 = vld [vmem:[#allocation4 + $0x18] sm:$0xff]   ;;  %v549_v18 = vunpack.c.l.s4 %v768_v17  ;;  %v843_v19 = vld [vmem:[#allocation6] ss:$0 sm:$0xff]  ;;  %vm513_vm2 = vcmask 1040384  }
  0x3a   :  { %651 = vmatprep.subr.bf16.mxu0 %v765_v0  ;;  %663 = vmatprep.subr.bf16.mxu1 %v765_v0  ;;  %v59_v11 = vpack.c.bf16 %v58_v9, %v57_v8  ;;  %v222_v15 = vunpack.c.0.s8 %v221_v13  ;;  %v852_v36 = vsub.s32 0, %v224_v16 }
  0x3b   :  { %v550_v24 = vunpack.c.0.s8 %v549_v18 }
  0x3c   :  { %v845_v21 = vsub.s32 %v222_v15, %v224_v16 }
  0x3d   :  { %652 = vmatpush3.bf16.msra.mxu0 %v684_v3  ;;  %664 = vmatpush3.bf16.msra.mxu1 %v685_v4  ;;  %v856_v41 = vsub.s32 %v550_v24, %v224_v16 }
  0x3e   :  { %653 = vmatprep.subr.bf16.mxu0 %v765_v0  ;;  %665 = vmatprep.subr.bf16.mxu1 %v765_v0 }
  0x41   :  { %654 = vmatpush3.bf16.msra.mxu0 %v686_v5  ;;  %666 = vmatpush3.bf16.msra.mxu1 %v687_v6 }
  0x42   :  { %655 = vmatprep.subr.bf16.mxu0 %v765_v0  ;;  %667 = vmatprep.subr.bf16.mxu1 %v765_v0 }
  0x45   :  { %656 = vmatpush3.bf16.msra.mxu0 %v688_v7  ;;  %668 = vmatpush3.bf16.msra.mxu1 %v689_v10 }
  0x48   :  { %658 = vmatmul.mubr.msk.bf16.vlgmr.msra.gmra.mrb[0].mxu0 %vm99_vm1, %v59_v11  ;;  %670 = vmatmul.mubr.msk.bf16.vlgmr.msra.gmra.mrb[0].mxu1 %vm99_vm1, %v59_v11 }
 0x11b   :  { %v137_v20 = vpop.f32.mrb[0].mxu0  ;;  %v210_v23 = vpop.f32.mrb[0].mxu1 }
 0x11c   :  { %v138_v22 = vadd.f32 %v843_v19, %v137_v20  ;;  %v659_v25 = vpop.f32.mrb[1].mxu0  ;;  %v211_v26 = vadd.f32 %v843_v19, %v210_v23  ;;  %v671_v27 = vpop.f32.mrb[1].mxu1 }
 0x11d   :  { %v140_v28 = vpop.f32.mrb[2].mxu0  ;;  %v213_v32 = vpop.f32.mrb[2].mxu1 }
 0x11e   :  { %v219_v29 = vcombine.high %v138_v22, %v138_v22  ;;  %v226_v30 = vrot.slane %v138_v22, %v845_v21  ;;  %v141_v31 = vadd.f32 %v843_v19, %v140_v28  ;;  %v660_v33 = vpop.f32.mrb[3].mxu0  ;;  %v335_v34 = vcombine.high %v211_v26, %v211_v26  ;;  %v672_v37 = vpop.f32.mrb[3].mxu1 }
 0x11f   :  { %v342_v35 = vrot.slane %v211_v26, %v845_v21  ;;  %v214_v17 = vadd.f32 %v843_v19, %v213_v32 }
 0x120   :  { %v233_v38 = vrot.slane %v219_v29, %v845_v21  ;;  %v234_v39 = vcombine.high %v226_v30, %v226_v30  ;;  %v242_v40 = vrot.slane %v226_v30, %v845_v21  ;;  %v349_v42 = vrot.slane %v335_v34, %v845_v21 }
 0x121   :  { %v350_v43 = vcombine.high %v342_v35, %v342_v35  ;;  %v358_v44 = vrot.slane %v342_v35, %v845_v21  ;;  %v268_v45 = vcombine.high %v141_v31, %v141_v31  ;;  %v275_v9 = vrot.slane %v141_v31, %v845_v21 }
 0x122   :  { %v235_v46 = vcombine.high %v233_v38, %v233_v38  ;;  %v249_v47 = vrot.slane %v233_v38, %v845_v21  ;;  %v256_v48 = vrot.slane %v234_v39, %v845_v21  ;;  %v264_v49 = vcombine.high %v242_v40, %v242_v40 }
 0x123   :  { %v351_v50 = vcombine.high %v349_v42, %v349_v42  ;;  %v365_v51 = vrot.slane %v349_v42, %v845_v21  ;;  %v372_v52 = vrot.slane %v350_v43, %v845_v21  ;;  %v380_v53 = vcombine.high %v358_v44, %v358_v44 }
 0x124   :  { %v263_v54 = vrot.slane %v235_v46, %v845_v21  ;;  %v265_v55 = vcombine.high %v249_v47, %v249_v47  ;;  %v266_v56 = vcombine.high %v256_v48, %v256_v48  ;;  %v436_v57 = vrot.slane %v358_v44, %v852_v36 }
 0x125   :  { %v379_v58 = vrot.slane %v351_v50, %v845_v21  ;;  %v381_v59 = vcombine.high %v365_v51, %v365_v51  ;;  %v382_v60 = vcombine.high %v372_v52, %v372_v52  ;;  %v440_v61 = vrot.slane %v372_v52, %v852_v36 }
 0x126   :  { %v267_v62 = vcombine.high %v263_v54, %v263_v54  ;;  %v444_v63 = vrot.slane %v380_v53, %v852_v36  ;;  %v452_v0 = vrot.slane %v365_v51, %v852_v36  ;;  %v514_v1 = vsel %vm513_vm2, %v242_v40, %v436_v57 }
 0x127   :  { %v383_v2 = vcombine.high %v379_v58, %v379_v58  ;;  %v448_v3 = vrot.slane %v382_v60, %v852_v36  ;;  %v456_v4 = vrot.slane %v379_v58, %v852_v36  ;;  %v460_v5 = vrot.slane %v381_v59, %v852_v36 }
 0x128   :  { %v515_v6 = vsel %vm513_vm2, %v256_v48, %v440_v61  ;;  %v516_v7 = vsel %vm513_vm2, %v264_v49, %v444_v63  ;;  %v518_v8 = vsel %vm513_vm2, %v249_v47, %v452_v0  ;;  %v282_v20 = vrot.slane %v268_v45, %v845_v21 }
 0x129   :  { %v464_v10 = vrot.slane %v383_v2, %v852_v36  ;;  %v517_v11 = vsel %vm513_vm2, %v266_v56, %v448_v3  ;;  %v519_v12 = vsel %vm513_vm2, %v263_v54, %v456_v4  ;;  %v520_v13 = vsel %vm513_vm2, %v265_v55, %v460_v5 }
 0x12a   :  { %v546_v14 = vcombine.low %v514_v1, %v515_v6  ;;  %v547_v15 = vcombine.low %v516_v7, %v517_v11  ;;  %v563_v16 = vcombine.low %v518_v8, %v519_v12  ;;  %v283_v26 = vcombine.high %v275_v9, %v275_v9 }
 0x12b   :  { %v521_v18 = vsel %vm513_vm2, %v267_v62, %v464_v10  ;;  %v384_v29 = vcombine.high %v214_v17, %v214_v17  ;;  %v391_v30 = vrot.slane %v214_v17, %v845_v21  ;;  %v284_v31 = vcombine.high %v282_v20, %v282_v20 }
 0x12c   :  { %v554_v22 = vrot.slane %v546_v14, %v856_v41  ;;  %v561_v23 = vrot.slane %v547_v15, %v856_v41  ;;  %v564_v24 = vcombine.low %v520_v13, %v521_v18  ;;  %v571_v25 = vrot.slane %v563_v16, %v856_v41 }
 0x12d   :  { %v291_v19 = vrot.slane %v275_v9, %v845_v21  ;;  %v298_v32 = vrot.slane %v282_v20, %v845_v21  ;;  %v398_v34 = vrot.slane %v384_v29, %v845_v21  ;;  %v399_v35 = vcombine.high %v391_v30, %v391_v30 }
 0x12e   :  { %v562_v27 = vcombine.low %v554_v22, %v561_v23  ;;  %v578_v28 = vrot.slane %v564_v24, %v856_v41  ;;  %v407_v37 = vrot.slane %v391_v30, %v845_v21  ;;  %v305_v38 = vrot.slane %v283_v26, %v845_v21 }
 0x12f   :  { %v400_v39 = vcombine.high %v398_v34, %v398_v34  ;;  %v414_v40 = vrot.slane %v398_v34, %v845_v21  ;;  %v421_v42 = vrot.slane %v399_v35, %v845_v21  ;;  %v312_v44 = vrot.slane %v284_v31, %v845_v21 }
 0x130   :  { %v579_v33 = vcombine.low %v571_v25, %v578_v28  ;;  %618 = vst [vmem:[%s935_s4] sm:$0xff] %v562_v27  ;;  %v429_v43 = vcombine.high %v407_v37, %v407_v37  ;;  %v313_v45 = vcombine.high %v291_v19, %v291_v19  ;;  %v314_v46 = vcombine.high %v298_v32, %v298_v32 }
 0x131   :  { %v468_v47 = vrot.slane %v407_v37, %v852_v36  ;;  %v428_v48 = vrot.slane %v400_v39, %v845_v21  ;;  %v430_v49 = vcombine.high %v414_v40, %v414_v40  ;;  %v431_v50 = vcombine.high %v421_v42, %v421_v42 }
 0x132   :  { %619 = vst [vmem:[%s935_s4 + $0x8] sm:$0xff] %v579_v33  ;;  %v472_v51 = vrot.slane %v421_v42, %v852_v36  ;;  %v315_v52 = vcombine.high %v305_v38, %v305_v38  ;;  %v476_v53 = vrot.slane %v429_v43, %v852_v36  ;;  %v484_v54 = vrot.slane %v414_v40, %v852_v36 }
 0x133   :  { %v522_v55 = vsel %vm513_vm2, %v291_v19, %v468_v47  ;;  %v432_v56 = vcombine.high %v428_v48, %v428_v48  ;;  %v480_v57 = vrot.slane %v431_v50, %v852_v36  ;;  %v488_v58 = vrot.slane %v428_v48, %v852_v36 }
 0x134   :  { %v492_v59 = vrot.slane %v430_v49, %v852_v36  ;;  %v316_v60 = vcombine.high %v312_v44, %v312_v44  ;;  %v523_v21 = vsel %vm513_vm2, %v305_v38, %v472_v51  ;;  %v524_v61 = vsel %vm513_vm2, %v313_v45, %v476_v53 }
 0x135   :  { %v526_v62 = vsel %vm513_vm2, %v298_v32, %v484_v54  ;;  %v496_v63 = vrot.slane %v432_v56, %v852_v36  ;;  %v525_v0 = vsel %vm513_vm2, %v315_v52, %v480_v57  ;;  %v527_v1 = vsel %vm513_vm2, %v312_v44, %v488_v58 }
 0x136   :  { %v528_v2 = vsel %vm513_vm2, %v314_v46, %v492_v59  ;;  %v580_v3 = vcombine.low %v522_v55, %v523_v21  ;;  %v581_v4 = vcombine.low %v524_v61, %v525_v0  ;;  %v597_v5 = vcombine.low %v526_v62, %v527_v1 }
 0x137   :  { %v529_v6 = vsel %vm513_vm2, %v316_v60, %v496_v63 }
 0x138   :  { %v588_v7 = vrot.slane %v580_v3, %v856_v41  ;;  %v595_v8 = vrot.slane %v581_v4, %v856_v41  ;;  %v598_v9 = vcombine.low %v528_v2, %v529_v6  ;;  %v605_v11 = vrot.slane %v597_v5, %v856_v41 }
 0x13a   :  { %v596_v10 = vcombine.low %v588_v7, %v595_v8  ;;  %v612_v36 = vrot.slane %v598_v9, %v856_v41 }
 0x13c   :  { %v613_v12 = vcombine.low %v605_v11, %v612_v36  ;;  %620 = vst [vmem:[%s935_s4 + $0x10] sm:$0xff] %v596_v10 }
 0x13e   :  { %621 = vst [vmem:[%s935_s4 + $0x18] sm:$0xff] %v613_v12 }
 0x13f   :  { %626 = vsyncpa [#allocation3], 1 }
 0x140   :  { %627 = vsyncpa [#allocation5], 1 }

// kernel: up_block_forward.5
= control target key start
LH: loop header
LB: loop body
LE: loop exit
PB: predicated region body
PF: predicated region fallthrough
CT: control target
= control target key end

     0   :  { %v40_v0 = vlaneseq  ;;  %vm25_vm0 = vcmask 1040384   ;;  %vm380_vm4 = vcmask 1041408   ;;  %v762_v14 = vmov 1.0   ;;  %s917_s1 = inlined_call_operand.vmem [shape: bf16[3,128,128], index: 1, kind: input, shape index: {}]   ;;  %s918_s0 = inlined_call_operand.vmem [shape: f32[32,128], index: 0, kind: input, shape index: {}]   ;;  %s919_s2 = inlined_call_operand.vmem [shape: f32[1,128], index: 2, kind: input, shape index: {}]   ;;  %s920_s3 = inlined_call_operand.vmem [shape: f32[32,128], index: 3, kind: output, shape index: {0}]   ;;  %s921_s4 = inlined_call_operand.vmem [shape: f32[1,2,128], index: 4, kind: output, shape index: {1}]  }
   0x1   :  { %v738_v1 = vld [vmem:[%s917_s1] sm:$0xff]   ;;  %v739_v2 = vld [vmem:[%s917_s1 + $0x8] sm:$0xff]   ;;  %v740_v5 = vld [vmem:[%s917_s1 + $0x10] sm:$0xff]   ;;  %v381_v15 = vrot.slane %v762_v14, 6  ;;  %v763_v18 = vmov 0.0   ;;  %vm421_vm7 = vcmask 1046528  }
   0x2   :  { %v41_v3 = vshrl.u32 %v40_v0, 7  ;;  %688 = vmatprep.subr.bf16.mxu0 %v738_v1  ;;  %v741_v9 = vld [vmem:[%s917_s1 + $0x18] sm:$0xff]   ;;  %v746_v11 = vld [vmem:[%s917_s1 + $0x40] sm:$0xff]   ;;  %v18_v13 = vld [vmem:[%s918_s0 + $0x8] sm:$0xff]  ;;  %vm147_vm6 = vsmask.f32 7424 }
   0x3   :  { %689 = vmatpush3.bf16.msra.mxu0 %v738_v1  ;;  %v17_v12 = vld [vmem:[%s918_s0] sm:$0xff]  ;;  %668 = vmatprep.subr.bf16.mxu1 %v746_v11  ;;  %v27_v17 = vrot.slane %v18_v13, 7  ;;  %v748_v25 = vld [vmem:[%s917_s1 + $0x48] sm:$0xff]   ;;  %v19_v26 = vld [vmem:[%s918_s0 + $0x10] sm:$0xff] }
   0x4   :  { %v42_v4 = vadd.s32 8, %v41_v3  ;;  %690 = vmatprep.subr.bf16.mxu0 %v739_v2  ;;  %v44_v6 = vadd.s32 24, %v41_v3  ;;  %v49_v7 = vand.u32 15, %v41_v3  ;;  %v26_v16 = vrot.slane %v17_v12, 7  ;;  %v742_v21 = vld [vmem:[%s917_s1 + $0x20] sm:$0xff]   ;;  %669 = vmatpush3.bf16.msra.mxu1 %v746_v11  ;;  %v20_v31 = vld [vmem:[%s918_s0 + $0x18] sm:$0xff] }
   0x5   :  { %v43_v27 = vadd.s32 16, %v41_v3  ;;  %670 = vmatprep.subr.bf16.mxu1 %v748_v25  ;;  %v29_v33 = vrot.slane %v19_v26, 7  ;;  %v31_v34 = vrot.slane %v20_v31, 7  ;;  %v750_v38 = vld [vmem:[%s917_s1 + $0x50] sm:$0xff]   ;;  %v743_v39 = vld [vmem:[%s917_s1 + $0x28] sm:$0xff]   ;;  %v752_v42 = vld [vmem:[%s917_s1 + $0x58] sm:$0xff]  }
   0x6   :  { %v56_v8 = vand.u32 15, %v42_v4  ;;  %v70_v10 = vand.u32 15, %v44_v6  ;;  %vm93_vm1 = vcmp.ne.s32.totalorder %v49_v7, 0  ;;  %v28_v23 = vsel %vm25_vm0, %v26_v16, %v27_v17  ;;  %v744_v44 = vld [vmem:[%s917_s1 + $0x30] sm:$0xff]   ;;  %v754_v51 = vld [vmem:[%s917_s1 + $0x60] sm:$0xff]   ;;  %v745_v59 = vld [vmem:[%s917_s1 + $0x38] sm:$0xff]  }
   0x7   :  { %691 = vmatpush3.bf16.msra.mxu0 %v739_v2  ;;  %v577_v19 = vsel %vm93_vm1, 1.0, %v763_v18  ;;  %v38_v24 = vsel %vm25_vm0, 0.0, %v26_v16  ;;  %v63_v35 = vand.u32 15, %v43_v27  ;;  %v30_v40 = vsel %vm25_vm0, %v27_v17, %v29_v33  ;;  %v756_v61 = vld [vmem:[%s917_s1 + $0x68] sm:$0xff]   ;;  %v747_v4 = vld [vmem:[%s917_s1 + $0x80] sm:$0xff]   ;;  %v760_v12 = vld [vmem:[%s917_s1 + $0x78] sm:$0xff]  }
   0x8   :  { %692 = vmatprep.subr.bf16.mxu0 %v740_v5  ;;  %vm365_vm2 = vcmp.ne.s32.totalorder %v56_v8, 15  ;;  %vm367_vm3 = vcmp.ne.s32.totalorder %v70_v10, 15  ;;  %v105_v28 = vmul.f32 %v577_v19, %v38_v24  ;;  %v127_v29 = vpack.c.bf16 %v28_v23, %v38_v24  ;;  %671 = vmatpush3.bf16.msra.mxu1 %v748_v25  ;;  %v749_v11 = vld [vmem:[%s917_s1 + $0x88] sm:$0xff]   ;;  %v751_v16 = vld [vmem:[%s917_s1 + $0x90] sm:$0xff]   ;;  %v755_v19 = vld [vmem:[%s917_s1 + $0xa0] sm:$0xff]  }
   0x9   :  { %v611_v20 = vsel %vm365_vm2, 1.0, %v763_v18  ;;  %v813_v22 = vsel %vm367_vm3, 1.0, %v763_v18  ;;  %v32_v41 = vsel %vm25_vm0, %v29_v33, %v31_v34  ;;  %672 = vmatprep.subr.bf16.mxu1 %v750_v38  ;;  %vm842_vm5 = vcmp.ne.s32.totalorder %v63_v35, 0  ;;  %v761_v25 = vld [vmem:[%s917_s1 + $0xb8] sm:$0xff]  }
   0xa   :  { %v382_v30 = vrot.slane %v611_v20, 6  ;;  %v386_v32 = vrot.slane %v813_v22, 6  ;;  %v109_v36 = vpack.c.bf16 %v28_v23, %v105_v28  ;;  %v151_v37 = vshll.u32 %v127_v29, 16  ;;  %v757_v20 = vld [vmem:[%s917_s1 + $0xa8] sm:$0xff]  }
   0xb   :  { %693 = vmatpush3.bf16.msra.mxu0 %v740_v5  ;;  %v128_v43 = vpack.c.bf16 %v32_v41, %v30_v40  ;;  %v149_v46 = vshrl.u32 %v127_v29, 16  ;;  %v393_v53 = vmul.f32 %v381_v15, %v38_v24  ;;  %v578_v60 = vsel %vm842_vm5, 1.0, %v763_v18  ;;  %v758_v5 = vld [vmem:[%s917_s1 + $0x70] sm:$0xff]   ;;  %v753_v18 = vld [vmem:[%s917_s1 + $0x98] sm:$0xff]  }
   0xc   :  { %694 = vmatprep.subr.bf16.mxu0 %v741_v9  ;;  %704 = vmatprep.mubr.bf16.mxu0 %v109_v36  ;;  %v383_v45 = vsel %vm380_vm4, %v381_v15, %v382_v30  ;;  %v387_v48 = vsel %vm380_vm4, %v381_v15, %v386_v32  ;;  %v153_v49 = vrot.slane %v151_v37, 1  ;;  %v385_v50 = vsel %vm380_vm4, %v382_v30, %v381_v15 }
   0xd   :  { %673 = vmatpush3.bf16.msra.mxu1 %v750_v38  ;;  %v156_v52 = vshll.u32 %v128_v43, 16  ;;  %v394_v54 = vmul.f32 %v383_v45, %v28_v23  ;;  %v396_v55 = vmul.f32 %v387_v48, %v32_v41  ;;  %v395_v58 = vmul.f32 %v385_v50, %v30_v40  ;;  %v759_v23 = vld [vmem:[%s917_s1 + $0xb0] sm:$0xff]  }
   0xe   :  { %674 = vmatprep.subr.bf16.mxu1 %v752_v42  ;;  %v154_v56 = vor.u32 %v153_v49, %v149_v46  ;;  %v39_v62 = vsel %vm25_vm0, %v31_v34, 0.0  ;;  %v107_v0 = vmul.f32 %v578_v60, %v30_v40 }
   0xf   :  { %695 = vmatpush3.bf16.msra.mxu0 %v741_v9  ;;  %v158_v57 = vrot.slane %v156_v52, 1  ;;  %v398_v63 = vpack.c.bf16 %v394_v54, %v393_v53  ;;  %v399_v2 = vpack.c.bf16 %v396_v55, %v395_v58  ;;  %v129_v3 = vpack.c.bf16 %v39_v62, %v39_v62 }
  0x10   :  { %696 = vmatprep.subr.bf16.mxu0 %v742_v21  ;;  %v110_v6 = vpack.c.bf16 %v32_v41, %v107_v0  ;;  %v160_v9 = vshrl.u32 %v128_v43, 16 }
  0x11   :  { %675 = vmatpush3.bf16.msra.mxu1 %v752_v42  ;;  %v159_v1 = vsel %vm147_vm6, %v154_v56, %v158_v57  ;;  %v422_v7 = vrot.slane %v398_v63, 1  ;;  %v423_v8 = vrot.slane %v399_v2, 1  ;;  %v164_v10 = vshll.u32 %v129_v3, 16 }
  0x12   :  { %676 = vmatprep.subr.bf16.mxu1 %v754_v51  ;;  %684 = vmatprep.mubr.bf16.mxu1 %v159_v1  ;;  %v162_v14 = vor.u32 %v160_v9, %v158_v57 }
  0x13   :  { %697 = vmatpush3.bf16.msra.mxu0 %v742_v21  ;;  %v424_v13 = vsel %vm421_vm7, %v422_v7, %v423_v8  ;;  %v166_v15 = vrot.slane %v164_v10, 1  ;;  %v397_v21 = vmul.f32 %v386_v32, %v39_v62  ;;  %v637_v32 = vld [vmem:[%s919_s2] ss:$0 sm:$0xff] }
  0x14   :  { %698 = vmatprep.subr.bf16.mxu0 %v743_v39 }
  0x15   :  { %677 = vmatpush3.bf16.msra.mxu1 %v754_v51  ;;  %v167_v17 = vsel %vm147_vm6, %v162_v14, %v166_v15  ;;  %v400_v24 = vpack.c.bf16 %v397_v21, %v397_v21 }
  0x16   :  { %678 = vmatprep.subr.bf16.mxu1 %v756_v61 }
  0x17   :  { %699 = vmatpush3.bf16.msra.mxu0 %v743_v39  ;;  %v425_v26 = vrot.slane %v400_v24, 1 }
  0x18   :  { %700 = vmatprep.subr.bf16.mxu0 %v744_v44 }
  0x19   :  { %679 = vmatpush3.bf16.msra.mxu1 %v756_v61  ;;  %v426_v27 = vsel %vm421_vm7, %v423_v8, %v425_v26 }
  0x1a   :  { %680 = vmatprep.subr.bf16.mxu1 %v758_v5 }
  0x1b   :  { %701 = vmatpush3.bf16.msra.mxu0 %v744_v44 }
  0x1c   :  { %702 = vmatprep.subr.bf16.mxu0 %v745_v59 }
  0x1d   :  { %681 = vmatpush3.bf16.msra.mxu1 %v758_v5 }
  0x1e   :  { %682 = vmatprep.subr.bf16.mxu1 %v760_v12 }
  0x1f   :  { %703 = vmatpush3.bf16.msra.mxu0 %v745_v59 }
  0x20   :  { %708 = vmatprep.subr.bf16.mxu0 %v747_v4 }
  0x21   :  { %683 = vmatpush3.bf16.msra.mxu1 %v760_v12 }
  0x22   :  { %705 = vmatmul.mubr.bf16.vlgmr.msra.gmra.mrb[0].mxu0 %v110_v6 }
  0x23   :  { %709 = vmatpush3.bf16.msra.mxu0 %v747_v4  ;;  %724 = vmatprep.mubr.bf16.mxu0 %v424_v13 }
  0x24   :  { %710 = vmatprep.subr.bf16.mxu0 %v749_v11  ;;  %685 = vmatmul.mubr.bf16.vlgmr.msra.gmra.mrb[0].mxu1 %v167_v17 }
  0x27   :  { %711 = vmatpush3.bf16.msra.mxu0 %v749_v11 }
  0x28   :  { %712 = vmatprep.subr.bf16.mxu0 %v751_v16 }
  0x2b   :  { %713 = vmatpush3.bf16.msra.mxu0 %v751_v16 }
  0x2c   :  { %714 = vmatprep.subr.bf16.mxu0 %v753_v18 }
  0x2f   :  { %715 = vmatpush3.bf16.msra.mxu0 %v753_v18 }
  0x30   :  { %716 = vmatprep.subr.bf16.mxu0 %v755_v19 }
  0x33   :  { %717 = vmatpush3.bf16.msra.mxu0 %v755_v19 }
  0x34   :  { %718 = vmatprep.subr.bf16.mxu0 %v757_v20 }
  0x37   :  { %719 = vmatpush3.bf16.msra.mxu0 %v757_v20 }
  0x38   :  { %720 = vmatprep.subr.bf16.mxu0 %v759_v23 }
  0x3b   :  { %721 = vmatpush3.bf16.msra.mxu0 %v759_v23 }
  0x3c   :  { %722 = vmatprep.subr.bf16.mxu0 %v761_v25 }
  0x3f   :  { %723 = vmatpush3.bf16.msra.mxu0 %v761_v25 }
  0x42   :  { %725 = vmatmul.mubr.bf16.vlgmr.msra.gmra.mrb[0].mxu0 %v426_v27 }
  0xf7   :  { %v686_v22 = vpop.f32.mrb[0].mxu1 }
  0xf8   :  { %v252_v28 = vpop.f32.mrb[1].mxu1 }
  0xf9   :  { %v687_v29 = vpop.f32.mrb[2].mxu1 }
  0xfa   :  { %v255_v30 = vpop.f32.mrb[3].mxu1 }
 0x115   :  { %v726_v31 = vpop.f32.mrb[0].mxu0 }
 0x116   :  { %v728_v33 = vadd.f32 %v726_v31, %v686_v22  ;;  %v511_v34 = vpop.f32.mrb[1].mxu0 }
 0x117   :  { %v729_v35 = vadd.f32 %v511_v34, %v252_v28  ;;  %v727_v36 = vpop.f32.mrb[2].mxu0 }
 0x118   :  { %v539_v37 = vadd.f32 %v728_v33, %v637_v32  ;;  %v730_v38 = vadd.f32 %v727_v36, %v687_v29  ;;  %v514_v39 = vpop.f32.mrb[3].mxu0 }
 0x119   :  { %v537_v40 = vadd.f32 %v729_v35, %v637_v32  ;;  %v731_v41 = vadd.f32 %v514_v39, %v255_v30 }
 0x11a   :  { %543 = vst [vmem:[%s920_s3 + $0x10] sm:$0xff] %v539_v37  ;;  %v540_v42 = vadd.f32 %v730_v38, %v637_v32  ;;  %v556_v47 = vmul.f32 %v539_v37, %v539_v37 }
 0x11b   :  { %541 = vst [vmem:[%s920_s3] sm:$0xff] %v537_v40  ;;  %v538_v43 = vadd.f32 %v731_v41, %v637_v32  ;;  %v554_v44 = vmul.f32 %v537_v40, %v537_v40 }
 0x11c   :  { %544 = vst [vmem:[%s920_s3 + $0x18] sm:$0xff] %v540_v42  ;;  %v557_v50 = vmul.f32 %v540_v42, %v540_v42 }
 0x11d   :  { %542 = vst [vmem:[%s920_s3 + $0x8] sm:$0xff] %v538_v43  ;;  %v545_v45 = vadd.f32 %v538_v43, %v537_v40  ;;  %v555_v46 = vmul.f32 %v538_v43, %v538_v43 }
 0x11f   :  { %v546_v48 = vadd.f32 %v545_v45, %v539_v37  ;;  %v558_v49 = vadd.f32 %v555_v46, %v554_v44 }
 0x121   :  { %v547_v51 = vadd.f32 %v546_v48, %v540_v42  ;;  %v559_v52 = vadd.f32 %v558_v49, %v556_v47 }
 0x123   :  { %v548_v53 = vrot.slane %v547_v51, 4  ;;  %v560_v54 = vadd.f32 %v559_v52, %v557_v50 }
 0x125   :  { %v549_v55 = vadd.f32 %v548_v53, %v547_v51  ;;  %v561_v56 = vrot.slane %v560_v54, 4 }
 0x127   :  { %v550_v57 = vrot.slane %v549_v55, 2  ;;  %v562_v58 = vadd.f32 %v561_v56, %v560_v54 }
 0x129   :  { %v551_v59 = vadd.f32 %v550_v57, %v549_v55  ;;  %v563_v60 = vrot.slane %v562_v58, 2 }
 0x12b   :  { %v552_v61 = vrot.slane %v551_v59, 1  ;;  %v564_v62 = vadd.f32 %v563_v60, %v562_v58 }
 0x12d   :  { %v565_v63 = vrot.slane %v564_v62, 1  ;;  %v553_v0 = vadd.f32 %v552_v61, %v551_v59 }
 0x12f   :  { %v566_v1 = vadd.f32 %v565_v63, %v564_v62 }
 0x131   :  { %v567_v2 = vsel %vm25_vm0, %v553_v0, %v566_v1 }
 0x132   :  { %568 = vst [vmem:[%s921_s4] sm:$0x3] %v567_v2 }

// kernel: up_block_forward.6
= control target key start
LH: loop header
LB: loop body
LE: loop exit
PB: predicated region body
PF: predicated region fallthrough
CT: control target
= control target key end

     0   :  { %v104_v20 = vlaneseq  ;;  %v836_v57 = vmov 0.0   ;;  %vm444_vm2 = vcmask 1041408   ;;  %vm89_vm4 = vcmask 1040384   ;;  %s1037_s3 = inlined_call_operand.vmem [shape: bf16[3,128,128], index: 3, kind: input, shape index: {}]   ;;  %s1038_s0 = inlined_call_operand.vmem [shape: f32[32,128], index: 0, kind: input, shape index: {}]   ;;  %s1039_s1 = inlined_call_operand.vmem [shape: f32[1,128], index: 1, kind: input, shape index: {}]   ;;  %s1040_s2 = inlined_call_operand.vmem [shape: f32[1,128], index: 2, kind: input, shape index: {}]   ;;  %s1041_s4 = inlined_call_operand.vmem [shape: f32[1,128], index: 4, kind: input, shape index: {}]   ;;  %s1042_s5 = inlined_call_operand.vmem [shape: f32[32,128], index: 5, kind: output, shape index: {0}]   ;;  %s1043_s6 = inlined_call_operand.vmem [shape: f32[1,2,128], index: 6, kind: output, shape index: {1}]  }
   0x1   :  { %v804_v0 = vld [vmem:[%s1037_s3] sm:$0xff]   ;;  %v805_v1 = vld [vmem:[%s1037_s3 + $0x8] sm:$0xff]   ;;  %v806_v2 = vld [vmem:[%s1037_s3 + $0x10] sm:$0xff]   ;;  %vm211_vm6 = vsmask.f32 7424  ;;  %vm485_vm7 = vcmask 1046528  }
   0x2   :  { %754 = vmatprep.subr.bf16.mxu0 %v804_v0  ;;  %v807_v3 = vld [vmem:[%s1037_s3 + $0x18] sm:$0xff]   ;;  %v812_v4 = vld [vmem:[%s1037_s3 + $0x40] sm:$0xff]   ;;  %v24_v6 = vld [vmem:[%s1038_s0 + $0x8] sm:$0xff]  ;;  %v105_v32 = vshrl.u32 %v104_v20, 7 }
   0x3   :  { %755 = vmatpush3.bf16.msra.mxu0 %v804_v0  ;;  %v23_v5 = vld [vmem:[%s1038_s0] sm:$0xff]  ;;  %734 = vmatprep.subr.bf16.mxu1 %v812_v4  ;;  %v814_v12 = vld [vmem:[%s1037_s3 + $0x48] sm:$0xff]   ;;  %v25_v15 = vld [vmem:[%s1038_s0 + $0x10] sm:$0xff] }
   0x4   :  { %756 = vmatprep.subr.bf16.mxu0 %v805_v1  ;;  %v641_v7 = vld [vmem:[%s1039_s1] ss:$0 sm:$0xff]  ;;  %735 = vmatpush3.bf16.msra.mxu1 %v812_v4  ;;  %v26_v16 = vld [vmem:[%s1038_s0 + $0x18] sm:$0xff]  ;;  %v809_v21 = vld [vmem:[%s1037_s3 + $0x28] sm:$0xff]   ;;  %v106_v39 = vadd.s32 8, %v105_v32  ;;  %v108_v47 = vadd.s32 24, %v105_v32 }
   0x5   :  { %v34_v8 = vmul.f32 %v641_v7, %v23_v5  ;;  %v35_v9 = vmul.f32 %v641_v7, %v24_v6  ;;  %v642_v10 = vld [vmem:[%s1040_s2] ss:$0 sm:$0xff]  ;;  %736 = vmatprep.subr.bf16.mxu1 %v814_v12  ;;  %v36_v17 = vmul.f32 %v641_v7, %v25_v15  ;;  %v37_v22 = vmul.f32 %v641_v7, %v26_v16  ;;  %v816_v26 = vld [vmem:[%s1037_s3 + $0x50] sm:$0xff]   ;;  %v818_v29 = vld [vmem:[%s1037_s3 + $0x58] sm:$0xff]  }
   0x6   :  { %v808_v11 = vld [vmem:[%s1037_s3 + $0x20] sm:$0xff]   ;;  %v810_v33 = vld [vmem:[%s1037_s3 + $0x30] sm:$0xff]   ;;  %v811_v44 = vld [vmem:[%s1037_s3 + $0x38] sm:$0xff]   ;;  %v120_v49 = vand.u32 15, %v106_v39  ;;  %v134_v55 = vand.u32 15, %v108_v47  ;;  %v113_v56 = vand.u32 15, %v105_v32 }
   0x7   :  { %757 = vmatpush3.bf16.msra.mxu0 %v805_v1  ;;  %v906_v13 = vadd.f32 %v642_v10, %v34_v8  ;;  %v908_v14 = vadd.f32 %v642_v10, %v35_v9  ;;  %v921_v23 = vadd.f32 %v642_v10, %v36_v17  ;;  %v928_v27 = vadd.f32 %v642_v10, %v37_v22  ;;  %v820_v36 = vld [vmem:[%s1037_s3 + $0x60] sm:$0xff]   ;;  %v822_v48 = vld [vmem:[%s1037_s3 + $0x68] sm:$0xff]   ;;  %v824_v54 = vld [vmem:[%s1037_s3 + $0x70] sm:$0xff]  }
   0x8   :  { %758 = vmatprep.subr.bf16.mxu0 %v806_v2  ;;  %737 = vmatpush3.bf16.msra.mxu1 %v814_v12  ;;  %v960_v52 = vld [vmem:[%s1037_s3 + $0x80] sm:$0xff]   ;;  %vm429_vm0 = vcmp.ne.s32.totalorder %v120_v49, 15  ;;  %v107_v59 = vadd.s32 16, %v105_v32  ;;  %v826_v60 = vld [vmem:[%s1037_s3 + $0x78] sm:$0xff]   ;;  %vm431_vm1 = vcmp.ne.s32.totalorder %v134_v55, 15  ;;  %vm971_vm3 = vcmp.ne.s32.totalorder %v113_v56, 0 }
   0x9   :  { %v53_v18 = vmul.f32 0.044715, %v906_v13  ;;  %v54_v19 = vmul.f32 0.044715, %v908_v14  ;;  %v55_v28 = vmul.f32 0.044715, %v921_v23  ;;  %738 = vmatprep.subr.bf16.mxu1 %v816_v26 }
   0xa   :  { %v56_v34 = vmul.f32 0.044715, %v928_v27  ;;  %v677_v58 = vsel %vm429_vm0, 1.0, %v836_v57  ;;  %v49_v61 = vmul.f32 0.5, %v906_v13  ;;  %v50_v63 = vmul.f32 0.5, %v908_v14  ;;  %v815_v49 = vld [vmem:[%s1037_s3 + $0x88] sm:$0xff]  }
   0xb   :  { %759 = vmatpush3.bf16.msra.mxu0 %v806_v2  ;;  %v57_v24 = vmul.f32 %v53_v18, %v906_v13  ;;  %v58_v25 = vmul.f32 %v54_v19, %v908_v14  ;;  %v59_v35 = vmul.f32 %v55_v28, %v921_v23  ;;  %v446_v5 = vrot.slane %v677_v58, 6  ;;  %v823_v2 = vld [vmem:[%s1037_s3 + $0xa8] sm:$0xff]  }
   0xc   :  { %760 = vmatprep.subr.bf16.mxu0 %v807_v3  ;;  %739 = vmatpush3.bf16.msra.mxu1 %v816_v26  ;;  %v60_v40 = vmul.f32 %v56_v34, %v928_v27  ;;  %v975_v7 = vsel %vm431_vm1, 1.0, %v836_v57  ;;  %v51_v8 = vmul.f32 0.5, %v921_v23  ;;  %v127_v9 = vand.u32 15, %v107_v59  ;;  %v817_v59 = vld [vmem:[%s1037_s3 + $0x90] sm:$0xff]  }
   0xd   :  { %v61_v30 = vmul.f32 %v57_v24, %v906_v13  ;;  %v62_v31 = vmul.f32 %v58_v25, %v908_v14  ;;  %740 = vmatprep.subr.bf16.mxu1 %v818_v29  ;;  %v63_v41 = vmul.f32 %v59_v35, %v921_v23  ;;  %v643_v17 = vsel %vm971_vm3, 1.0, %v836_v57 }
   0xe   :  { %v64_v45 = vmul.f32 %v60_v40, %v928_v27  ;;  %v450_v19 = vrot.slane %v975_v7, 6  ;;  %vm159_vm5 = vcmp.ne.s32.totalorder %v127_v9, 0 }
   0xf   :  { %761 = vmatpush3.bf16.msra.mxu0 %v807_v3  ;;  %v65_v37 = vadd.f32 %v61_v30, %v906_v13  ;;  %v66_v38 = vadd.f32 %v62_v31, %v908_v14  ;;  %v67_v46 = vadd.f32 %v63_v41, %v921_v23  ;;  %v837_v3 = vmov 1.0  }
  0x10   :  { %762 = vmatprep.subr.bf16.mxu0 %v808_v11  ;;  %741 = vmatpush3.bf16.msra.mxu1 %v818_v29  ;;  %v68_v50 = vadd.f32 %v64_v45, %v928_v27  ;;  %v445_v4 = vrot.slane %v837_v3, 6  ;;  %v52_v13 = vmul.f32 0.5, %v928_v27  ;;  %v644_v32 = vsel %vm159_vm5, 1.0, %v836_v57 }
  0x11   :  { %v69_v42 = vmul.f32 0.7978846, %v65_v37  ;;  %v70_v43 = vmul.f32 0.7978846, %v66_v38  ;;  %742 = vmatprep.subr.bf16.mxu1 %v820_v36  ;;  %v71_v51 = vmul.f32 0.7978846, %v67_v46 }
  0x12   :  { %v72_v53 = vmul.f32 0.7978846, %v68_v50  ;;  %v447_v18 = vsel %vm444_vm2, %v445_v4, %v446_v5  ;;  %v449_v24 = vsel %vm444_vm2, %v446_v5, %v445_v4  ;;  %v451_v35 = vsel %vm444_vm2, %v445_v4, %v450_v19 }
  0x13   :  { %763 = vmatpush3.bf16.msra.mxu0 %v808_v11  ;;  %828 = vtanh.f32 %v69_v42 }
  0x14   :  { %764 = vmatprep.subr.bf16.mxu0 %v809_v21  ;;  %830 = vtanh.f32 %v70_v43  ;;  %743 = vmatpush3.bf16.msra.mxu1 %v820_v36 }
  0x15   :  { %832 = vtanh.f32 %v71_v51  ;;  %744 = vmatprep.subr.bf16.mxu1 %v822_v48 }
  0x16   :  { %834 = vtanh.f32 %v72_v53 }
  0x17   :  { %765 = vmatpush3.bf16.msra.mxu0 %v809_v21 }
  0x18   :  { %766 = vmatprep.subr.bf16.mxu0 %v810_v33  ;;  %745 = vmatpush3.bf16.msra.mxu1 %v822_v48 }
  0x19   :  { %746 = vmatprep.subr.bf16.mxu1 %v824_v54 }
  0x1b   :  { %767 = vmatpush3.bf16.msra.mxu0 %v810_v33 }
  0x1c   :  { %768 = vmatprep.subr.bf16.mxu0 %v811_v44  ;;  %747 = vmatpush3.bf16.msra.mxu1 %v824_v54 }
  0x1d   :  { %v829_v62 = vpop.eup %828  ;;  %748 = vmatprep.subr.bf16.mxu1 %v826_v60 }
  0x1e   :  { %v831_v0 = vpop.eup %830  ;;  %v77_v1 = vadd.f32 1.0, %v829_v62 }
  0x1f   :  { %769 = vmatpush3.bf16.msra.mxu0 %v811_v44  ;;  %v78_v6 = vadd.f32 1.0, %v831_v0  ;;  %v833_v10 = vpop.eup %832 }
  0x20   :  { %774 = vmatprep.subr.bf16.mxu0 %v960_v52  ;;  %v81_v11 = vmul.f32 %v77_v1, %v49_v61  ;;  %v79_v14 = vadd.f32 1.0, %v833_v10  ;;  %v835_v15 = vpop.eup %834  ;;  %749 = vmatpush3.bf16.msra.mxu1 %v826_v60  ;;  %v821_v1 = vld [vmem:[%s1037_s3 + $0xa0] sm:$0xff]  }
  0x21   :  { %v82_v12 = vmul.f32 %v78_v6, %v50_v63  ;;  %v80_v21 = vadd.f32 1.0, %v835_v15  ;;  %v827_v6 = vld [vmem:[%s1037_s3 + $0xb8] sm:$0xff]  }
  0x22   :  { %v90_v16 = vrot.slane %v81_v11, 7  ;;  %v83_v22 = vmul.f32 %v79_v14, %v51_v8  ;;  %v703_v14 = vld [vmem:[%s1041_s4] ss:$0 sm:$0xff] }
  0x23   :  { %v91_v20 = vrot.slane %v82_v12, 7  ;;  %v84_v28 = vmul.f32 %v80_v21, %v52_v13 }
  0x24   :  { %v102_v23 = vsel %vm89_vm4, 0.0, %v90_v16  ;;  %v93_v31 = vrot.slane %v83_v22, 7 }
  0x25   :  { %v92_v25 = vsel %vm89_vm4, %v90_v16, %v91_v20  ;;  %v169_v26 = vmul.f32 %v643_v17, %v102_v23  ;;  %v457_v27 = vmul.f32 %v445_v4, %v102_v23  ;;  %v95_v34 = vrot.slane %v84_v28, 7  ;;  %v825_v4 = vld [vmem:[%s1037_s3 + $0xb0] sm:$0xff]  }
  0x26   :  { %v191_v29 = vpack.c.bf16 %v92_v25, %v102_v23  ;;  %v458_v30 = vmul.f32 %v447_v18, %v92_v25  ;;  %v94_v38 = vsel %vm89_vm4, %v91_v20, %v93_v31 }
  0x27   :  { %v173_v33 = vpack.c.bf16 %v92_v25, %v169_v26  ;;  %v96_v40 = vsel %vm89_vm4, %v93_v31, %v95_v34  ;;  %v171_v41 = vmul.f32 %v644_v32, %v94_v38  ;;  %v103_v42 = vsel %vm89_vm4, %v95_v34, 0.0 }
  0x28   :  { %v215_v36 = vshll.u32 %v191_v29, 16  ;;  %v462_v37 = vpack.c.bf16 %v458_v30, %v457_v27  ;;  %v213_v39 = vshrl.u32 %v191_v29, 16  ;;  %v459_v43 = vmul.f32 %v449_v24, %v94_v38 }
  0x29   :  { %770 = vmatprep.mubr.bf16.mxu0 %v173_v33  ;;  %v460_v44 = vmul.f32 %v451_v35, %v96_v40  ;;  %v192_v45 = vpack.c.bf16 %v96_v40, %v94_v38  ;;  %v193_v47 = vpack.c.bf16 %v103_v42, %v103_v42  ;;  %v174_v48 = vpack.c.bf16 %v96_v40, %v171_v41 }
  0x2a   :  { %v217_v46 = vrot.slane %v215_v36, 1  ;;  %v486_v56 = vrot.slane %v462_v37, 1  ;;  %v461_v3 = vmul.f32 %v450_v19, %v103_v42 }
  0x2b   :  { %v220_v51 = vshll.u32 %v192_v45, 16  ;;  %v224_v53 = vshrl.u32 %v192_v45, 16  ;;  %v228_v54 = vshll.u32 %v193_v47, 16  ;;  %771 = vmatmul.mubr.bf16.vlgmr.msra.gmra.mrb[0].mxu0 %v174_v48  ;;  %v463_v55 = vpack.c.bf16 %v460_v44, %v459_v43 }
  0x2c   :  { %v218_v50 = vor.u32 %v217_v46, %v213_v39  ;;  %775 = vmatpush3.bf16.msra.mxu0 %v960_v52  ;;  %v819_v52 = vld [vmem:[%s1037_s3 + $0x98] sm:$0xff]   ;;  %v464_v5 = vpack.c.bf16 %v461_v3, %v461_v3 }
  0x2d   :  { %v222_v57 = vrot.slane %v220_v51, 1  ;;  %v230_v58 = vrot.slane %v228_v54, 1  ;;  %776 = vmatprep.subr.bf16.mxu0 %v815_v49  ;;  %v487_v60 = vrot.slane %v463_v55, 1 }
  0x2e   :  { %v489_v8 = vrot.slane %v464_v5, 1 }
  0x2f   :  { %v223_v61 = vsel %vm211_vm6, %v218_v50, %v222_v57  ;;  %v226_v62 = vor.u32 %v224_v53, %v222_v57  ;;  %v488_v63 = vsel %vm485_vm7, %v486_v56, %v487_v60 }
  0x30   :  { %750 = vmatprep.mubr.bf16.mxu1 %v223_v61  ;;  %777 = vmatpush3.bf16.msra.mxu0 %v815_v49  ;;  %v490_v9 = vsel %vm485_vm7, %v487_v60, %v489_v8 }
  0x31   :  { %v231_v0 = vsel %vm211_vm6, %v226_v62, %v230_v58  ;;  %790 = vmatprep.mubr.bf16.mxu0 %v488_v63  ;;  %778 = vmatprep.subr.bf16.mxu0 %v817_v59 }
  0x32   :  { %751 = vmatmul.mubr.bf16.vlgmr.msra.gmra.mrb[0].mxu1 %v231_v0 }
  0x34   :  { %779 = vmatpush3.bf16.msra.mxu0 %v817_v59 }
  0x35   :  { %780 = vmatprep.subr.bf16.mxu0 %v819_v52 }
  0x38   :  { %781 = vmatpush3.bf16.msra.mxu0 %v819_v52 }
  0x39   :  { %782 = vmatprep.subr.bf16.mxu0 %v821_v1 }
  0x3c   :  { %783 = vmatpush3.bf16.msra.mxu0 %v821_v1 }
  0x3d   :  { %784 = vmatprep.subr.bf16.mxu0 %v823_v2 }
  0x40   :  { %785 = vmatpush3.bf16.msra.mxu0 %v823_v2 }
  0x41   :  { %786 = vmatprep.subr.bf16.mxu0 %v825_v4 }
  0x44   :  { %787 = vmatpush3.bf16.msra.mxu0 %v825_v4 }
  0x45   :  { %788 = vmatprep.subr.bf16.mxu0 %v827_v6 }
  0x48   :  { %789 = vmatpush3.bf16.msra.mxu0 %v827_v6 }
  0x4b   :  { %791 = vmatmul.mubr.bf16.vlgmr.msra.gmra.mrb[0].mxu0 %v490_v9 }
 0x105   :  { %v752_v7 = vpop.f32.mrb[0].mxu1 }
 0x106   :  { %v316_v10 = vpop.f32.mrb[1].mxu1 }
 0x107   :  { %v753_v11 = vpop.f32.mrb[2].mxu1 }
 0x108   :  { %v319_v12 = vpop.f32.mrb[3].mxu1 }
 0x11e   :  { %v792_v13 = vpop.f32.mrb[0].mxu0 }
 0x11f   :  { %v794_v15 = vadd.f32 %v792_v13, %v752_v7  ;;  %v575_v16 = vpop.f32.mrb[1].mxu0 }
 0x120   :  { %v795_v17 = vadd.f32 %v575_v16, %v316_v10  ;;  %v793_v18 = vpop.f32.mrb[2].mxu0 }
 0x121   :  { %v603_v19 = vadd.f32 %v794_v15, %v703_v14  ;;  %v796_v20 = vadd.f32 %v793_v18, %v753_v11  ;;  %v578_v21 = vpop.f32.mrb[3].mxu0 }
 0x122   :  { %v601_v22 = vadd.f32 %v795_v17, %v703_v14  ;;  %v797_v23 = vadd.f32 %v578_v21, %v319_v12 }
 0x123   :  { %607 = vst [vmem:[%s1042_s5 + $0x10] sm:$0xff] %v603_v19  ;;  %v604_v24 = vadd.f32 %v796_v20, %v703_v14  ;;  %v620_v29 = vmul.f32 %v603_v19, %v603_v19 }
 0x124   :  { %605 = vst [vmem:[%s1042_s5] sm:$0xff] %v601_v22  ;;  %v602_v25 = vadd.f32 %v797_v23, %v703_v14  ;;  %v618_v26 = vmul.f32 %v601_v22, %v601_v22 }
 0x125   :  { %608 = vst [vmem:[%s1042_s5 + $0x18] sm:$0xff] %v604_v24  ;;  %v621_v32 = vmul.f32 %v604_v24, %v604_v24 }
 0x126   :  { %606 = vst [vmem:[%s1042_s5 + $0x8] sm:$0xff] %v602_v25  ;;  %v609_v27 = vadd.f32 %v602_v25, %v601_v22  ;;  %v619_v28 = vmul.f32 %v602_v25, %v602_v25 }
 0x128   :  { %v610_v30 = vadd.f32 %v609_v27, %v603_v19  ;;  %v622_v31 = vadd.f32 %v619_v28, %v618_v26 }
 0x12a   :  { %v611_v33 = vadd.f32 %v610_v30, %v604_v24  ;;  %v623_v34 = vadd.f32 %v622_v31, %v620_v29 }
 0x12c   :  { %v612_v35 = vrot.slane %v611_v33, 4  ;;  %v624_v36 = vadd.f32 %v623_v34, %v621_v32 }
 0x12e   :  { %v613_v37 = vadd.f32 %v612_v35, %v611_v33  ;;  %v625_v38 = vrot.slane %v624_v36, 4 }
 0x130   :  { %v614_v39 = vrot.slane %v613_v37, 2  ;;  %v626_v40 = vadd.f32 %v625_v38, %v624_v36 }
 0x132   :  { %v615_v41 = vadd.f32 %v614_v39, %v613_v37  ;;  %v627_v42 = vrot.slane %v626_v40, 2 }
 0x134   :  { %v616_v43 = vrot.slane %v615_v41, 1  ;;  %v628_v44 = vadd.f32 %v627_v42, %v626_v40 }
 0x136   :  { %v629_v45 = vrot.slane %v628_v44, 1  ;;  %v617_v46 = vadd.f32 %v616_v43, %v615_v41 }
 0x138   :  { %v630_v47 = vadd.f32 %v629_v45, %v628_v44 }
 0x13a   :  { %v631_v48 = vsel %vm89_vm4, %v617_v46, %v630_v47 }
 0x13b   :  { %632 = vst [vmem:[%s1043_s6] sm:$0x3] %v631_v48 }

</bundles_post_ra>
